<compile_context>
chip_gen: v5e
topology: v5e:2x2
jax: 0.10.0
libtpu: 0.0.40
codegen_flags: <defaults>
</compile_context>

<pallas_src>
import jax
import jax.numpy as jnp
from jax import lax
from jax.experimental import pallas as pl
from jax.experimental.pallas import tpu as pltpu


# ------------------------- model configuration ----------------------------
CONV_CFG = [(3, 8), (8, 8), "M", (8, 16), (16, 16), "M", (16, 32), (32, 32)]
FC_CFG = [(128, 64), (64, 64), (64, 10)]
INPUT_HW = 16

_LANES = 128                                   # lane width of every activation / rhs
_CIN0 = CONV_CFG[0][0]
_CIN0_EFF = ((_CIN0 + 7) // 8) * 8             # first conv input channels padded 3 -> 8
_VMEM_LIMIT_BYTES = 32 * 1024 * 1024           # actual use ~4 MiB; < v7x's 64 MiB physical


def _build_schedule():
    spatial, pool_after = [], {}
    s, li, pi = INPUT_HW, 0, 0
    for item in CONV_CFG:
        if item == "M":
            pool_after[li - 1] = pi
            pi += 1
            s //= 2
        else:
            spatial.append(s)
            li += 1
    pool_after[li - 1] = pi                    # the external self.max_pool
    return tuple(spatial), pool_after


_CONV_SPATIAL, _POOL_AFTER = _build_schedule()   # ((16,16,8,8,4,4), {1:0, 3:1, 5:2})


# --------------------- tiny in-kernel selection matrices ------------------
def _band(s, offset):
    """(s, s) f32 matrix: ones where col == row + offset (row-shift operator)."""
    r = lax.broadcasted_iota(jnp.int32, (s, s), 0)
    c = lax.broadcasted_iota(jnp.int32, (s, s), 1)
    return (c == r + offset).astype(jnp.float32)


def _every_other_row(m, n, parity):
    """(m, n) f32 matrix: ones where col == 2*row + parity (stride-2 row select)."""
    r = lax.broadcasted_iota(jnp.int32, (m, n), 0)
    c = lax.broadcasted_iota(jnp.int32, (m, n), 1)
    return (c == 2 * r + parity).astype(jnp.float32)


# ------------------------------ fused kernel ------------------------------
def _vgg_fused_kernel(x_ref, r_ref, b_ref, g0_ref, g1_ref, wfc_ref, bfc_ref, o_ref):
    f32 = jnp.float32
    a = x_ref[0]                                             # (16, 128) one image

    for li, s in enumerate(_CONV_SPATIAL):
        # conv3x3(stride 1, pad 1) + bias + ReLU at spatial size s:
        #   width taps + width padding folded into the Toeplitz weight r_ref[li],
        #   height taps + height padding applied with sub/super-diagonal shifts.
        p = jnp.dot(a, r_ref[li], preferred_element_type=f32)          # (s, 3*128)
        p0 = p[:, 0:_LANES]
        p1 = p[:, _LANES:2 * _LANES]
        p2 = p[:, 2 * _LANES:3 * _LANES]
        y = (jnp.dot(_band(s, -1), p0, preferred_element_type=f32)
             + p1
             + jnp.dot(_band(s, 1), p2, preferred_element_type=f32)
             + b_ref[li])
        a = jnp.maximum(y, 0.0)                                         # (s, 128)

        pi = _POOL_AFTER.get(li)
        if pi is not None:
            # 2x2 / stride-2 max pool: vertical pair max via stride-2 row
            # selectors, horizontal pair max via resident lane-gather matrices.
            # Output stays 128 lanes wide (upper 64 lanes are exactly zero).
            v = jnp.maximum(
                jnp.dot(_every_other_row(s // 2, s, 0), a, preferred_element_type=f32),
                jnp.dot(_every_other_row(s // 2, s, 1), a, preferred_element_type=f32))
            a = jnp.maximum(
                jnp.dot(v, g0_ref[pi], preferred_element_type=f32),
                jnp.dot(v, g1_ref[pi], preferred_element_type=f32))     # (s//2, 128)

    # TODO(synk): x.register_hook(self.activation_hook) captures backward
    # gradients of the features_conv output; there is no forward-pass equivalent.

    # Classifier (Linear+ReLU, Linear+ReLU, Linear) with hidden/out dims padded
    # to 128 lanes.  `a` is the 2x2-pooled map (2 rows, valid lanes w*32+c < 64);
    # torch's NCHW x.view(N,-1) flatten is folded into the pre-permuted, per-row
    # fc0 weight slabs wfc_ref[0]/wfc_ref[1].
    z_top = a[0:1, :]
    z_bot = a[1:2, :]
    h = (jnp.dot(z_top, wfc_ref[0], preferred_element_type=f32)
         + jnp.dot(z_bot, wfc_ref[1], preferred_element_type=f32)
         + bfc_ref[0])
    h = jnp.maximum(h, 0.0)
    # TODO(synk): nn.Dropout layers of the torch classifier act as identity (eval mode).
    h = jnp.maximum(jnp.dot(h, wfc_ref[2], preferred_element_type=f32) + bfc_ref[1], 0.0)
    logits = jnp.dot(h, wfc_ref[3], preferred_element_type=f32) + bfc_ref[2]
    o_ref[0] = logits.astype(o_ref.dtype)


# ---------------------- one-time weight re-layout (host) ------------------
def init_params(key):
    """Weights in PyTorch layouts: conv (Cout,Cin,3,3), linear (out,in)."""
    params = {}
    convs = [c for c in CONV_CFG if c != "M"]
    keys = jax.random.split(key, 2 * (len(convs) + len(FC_CFG)))
    k = 0
    for i, (cin, cout) in enumerate(convs):
        params[f"conv{i}_w"] = 0.1 * jax.random.normal(keys[k], (cout, cin, 3, 3), jnp.float32)
        params[f"conv{i}_b"] = 0.01 * jax.random.normal(keys[k + 1], (cout,), jnp.float32)
        k += 2
    for i, (fin, fout) in enumerate(FC_CFG):
        params[f"fc{i}_w"] = 0.1 * jax.random.normal(keys[k], (fout, fin), jnp.float32)
        params[f"fc{i}_b"] = 0.01 * jax.random.normal(keys[k + 1], (fout,), jnp.float32)
        k += 2
    return params


def _conv_toeplitz(w_torch, b, s):
    """Torch (Cout,Cin,3,3) -> width-Toeplitz R_cat (128, 3*128) and bias (1,128)."""
    cout, cin, kh, kw = w_torch.shape
    assert (kh, kw) == (3, 3)
    assert s * cout == _LANES, "width-Toeplitz conv requires W*Cout == 128"
    cin_eff = ((cin + 7) // 8) * 8
    assert s * cin_eff <= _LANES
    wt = jnp.transpose(w_torch, (2, 3, 1, 0))                       # (kh, kw, ci, co)
    wt = jnp.pad(wt, ((0, 0), (0, 0), (0, cin_eff - cin), (0, 0)))
    # eyes[t][w_in, w_out] = 1 iff w_in == w_out + t - 1  (kw taps + width padding)
    eyes = jnp.stack([jnp.eye(s, s, k=1 - t, dtype=w_torch.dtype) for t in range(kw)])
    r = jnp.einsum("hkic,kpx->hpixc", wt, eyes,
                   precision=lax.Precision.HIGHEST)                 # (3, s, ci, s, co)
    r = r.reshape(3, s * cin_eff, s * cout)
    r_cat = jnp.concatenate([r[0], r[1], r[2]], axis=1)             # (s*cin_eff, 384)
    r_cat = jnp.pad(r_cat, ((0, _LANES - s * cin_eff), (0, 0)))     # K padded to 128
    bias = jnp.tile(b, s).reshape(1, _LANES)
    return r_cat, bias


def _pool_gather(s, c, parity):
    """(128, 128) lane-gather for the horizontal half of a 2x2/stride-2 max pool."""
    assert s * c == _LANES
    i = jnp.arange(s * c)
    j = jnp.arange(_LANES)
    g = ((i[:, None] % c == j[None, :] % c)
         & (i[:, None] // c == 2 * (j[None, :] // c) + parity)
         & (j[None, :] < (s // 2) * c))
    return g.astype(jnp.float32)


def _prepare_classifier(params, c, hw):
    """fc weights transposed, fc0 rows permuted NCHW->kernel order, padded to 128x128."""
    assert hw * hw * c == FC_CFG[0][0]
    out0 = params["fc0_w"].shape[0]
    w0 = params["fc0_w"].T                                         # rows = torch NCHW flat idx
    w0 = w0.reshape(c, hw, hw, out0).transpose(1, 2, 0, 3)         # (h, w, c, out)
    w0 = w0.reshape(hw, hw * c, out0)                              # rows = w*c + ch per h-slab

    def pad2(m):
        return jnp.pad(m, ((0, _LANES - m.shape[0]), (0, _LANES - m.shape[1])))

    def pad1(v):
        return jnp.pad(v, (0, _LANES - v.shape[0])).reshape(1, _LANES)

    wfc = jnp.stack([pad2(w0[0]), pad2(w0[1]),
                     pad2(params["fc1_w"].T), pad2(params["fc2_w"].T)])   # (4,128,128)
    bfc = jnp.stack([pad1(params["fc0_b"]), pad1(params["fc1_b"]),
                     pad1(params["fc2_b"])])                              # (3,1,128)
    return wfc, bfc


def prepare_params(params):
    """One-time re-layout of PyTorch weights into the kernel's resident operands."""
    r_list, b_list, g0_list, g1_list = [], [], [], []
    s, ci, cout = INPUT_HW, 0, None
    for item in CONV_CFG:
        if item == "M":
            g0_list.append(_pool_gather(s, cout, 0))
            g1_list.append(_pool_gather(s, cout, 1))
            s //= 2
        else:
            _, cout = item
            r, bias = _conv_toeplitz(params[f"conv{ci}_w"], params[f"conv{ci}_b"], s)
            r_list.append(r)
            b_list.append(bias)
            ci += 1
    g0_list.append(_pool_gather(s, cout, 0))       # the external self.max_pool
    g1_list.append(_pool_gather(s, cout, 1))
    s //= 2
    wfc, bfc = _prepare_classifier(params, cout, s)
    return {
        "r": jnp.stack(r_list),        # (6, 128, 384)
        "b": jnp.stack(b_list),        # (6, 1, 128)
        "g0": jnp.stack(g0_list),      # (3, 128, 128)
        "g1": jnp.stack(g1_list),      # (3, 128, 128)
        "wfc": wfc,                    # (4, 128, 128)
        "bfc": bfc,                    # (3, 1, 128)
    }


# ------------------------------- forward ----------------------------------
def vgg_forward(prep, x_nchw):
    n, cin, h, w = x_nchw.shape
    # NCHW -> NHWC, first-layer channel pad 3 -> 8, (H,W,C) -> (H, W*C) merge:
    # the only non-Pallas ops in the forward (one-time, on the 3 KiB input).
    x = jnp.transpose(x_nchw, (0, 2, 3, 1))
    x = jnp.pad(x, ((0, 0), (0, 0), (0, 0), (0, _CIN0_EFF - cin)))
    x = x.reshape(n, h, w * _CIN0_EFF)                              # (N, 16, 128)

    logits = pl.pallas_call(
        _vgg_fused_kernel,
        out_shape=jax.ShapeDtypeStruct((n, 1, _LANES), x.dtype),
        grid=(n,),
        in_specs=[
            pl.BlockSpec((1, h, w * _CIN0_EFF), lambda i: (i, 0, 0)),  # per-image slab
            pl.BlockSpec(prep["r"].shape, lambda i: (0, 0, 0)),        # resident weights
            pl.BlockSpec(prep["b"].shape, lambda i: (0, 0, 0)),
            pl.BlockSpec(prep["g0"].shape, lambda i: (0, 0, 0)),
            pl.BlockSpec(prep["g1"].shape, lambda i: (0, 0, 0)),
            pl.BlockSpec(prep["wfc"].shape, lambda i: (0, 0, 0)),
            pl.BlockSpec(prep["bfc"].shape, lambda i: (0, 0, 0)),
        ],
        out_specs=pl.BlockSpec((1, 1, _LANES), lambda i: (i, 0, 0)),
        compiler_params=pltpu.CompilerParams(
            dimension_semantics=("parallel",),      # batch across the 2 TCs on v7x
            vmem_limit_bytes=_VMEM_LIMIT_BYTES,
        ),
    )(x, prep["r"], prep["b"], prep["g0"], prep["g1"], prep["wfc"], prep["bfc"])

    return logits[:, 0, :FC_CFG[-1][1]]


# ------------------------ pure-JAX reference (checking) --------------------
def _maxpool2x2_ref(x):
    return lax.reduce_window(x, -jnp.inf, lax.max, (1, 1, 2, 2), (1, 1, 2, 2), "VALID")


def vgg_forward_reference(params, x_nchw):
    x, ci = x_nchw, 0
    for item in CONV_CFG:
        if item == "M":
            x = _maxpool2x2_ref(x)
        else:
            x = lax.conv_general_dilated(
                x, params[f"conv{ci}_w"], (1, 1), ((1, 1), (1, 1)),
                dimension_numbers=("NCHW", "OIHW", "NCHW"),
                precision=lax.Precision.HIGHEST)
            x = jax.nn.relu(x + params[f"conv{ci}_b"][None, :, None, None])
            ci += 1
    x = _maxpool2x2_ref(x)                         # the external self.max_pool
    x = x.reshape(x.shape[0], -1)                  # torch x.view(N, -1) on NCHW
    for i in range(len(FC_CFG)):
        x = jnp.matmul(x, params[f"fc{i}_w"].T, precision=lax.Precision.HIGHEST)
        x = x + params[f"fc{i}_b"]
        if i < len(FC_CFG) - 1:
            x = jax.nn.relu(x)
    return x


if __name__ == "__main__":
    key = jax.random.PRNGKey(0)
    pkey, xkey = jax.random.split(key)
    params = init_params(pkey)
    prep = prepare_params(params)                 # one-time weight re-layout (hoisted)
    x = jax.random.normal(xkey, (2, _CIN0, INPUT_HW, INPUT_HW), dtype=jnp.float32)  # NCHW

    out = jax.jit(vgg_forward)(prep, x)
    out = jax.block_until_ready(out)

    assert out.shape == (2, FC_CFG[-1][1]), out.shape
    assert out.dtype == jnp.float32
    assert bool(jnp.all(jnp.isfinite(out)))

    ref = vgg_forward_reference(params, x)
    max_err = float(jnp.max(jnp.abs(out - ref)))
    assert max_err < 3e-2, f"kernel/reference mismatch: max_err={max_err}"

    print("KERNEL_OK")
</pallas_src>

<mosaic_0001>
module attributes {stable_mosaic.version = 11 : i64} {
  func.func @_vgg_fused_kernel(%arg0: i32, %arg1: memref<1x16x128xf32, #tpu.memory_space<vmem>>, %arg2: memref<6x128x384xf32, #tpu.memory_space<vmem>>, %arg3: memref<6x1x128xf32, #tpu.memory_space<vmem>>, %arg4: memref<3x128x128xf32, #tpu.memory_space<vmem>>, %arg5: memref<3x128x128xf32, #tpu.memory_space<vmem>>, %arg6: memref<4x128x128xf32, #tpu.memory_space<vmem>>, %arg7: memref<3x1x128xf32, #tpu.memory_space<vmem>>, %arg8: memref<1x1x128xf32, #tpu.memory_space<vmem>>) attributes {dimension_semantics = [#tpu.dimension_semantics<parallel>], iteration_bounds = array<i64: 2>, scalar_prefetch = 0 : i64, scratch_operands = 0 : i64, tpu.core_type = #tpu.core_type<tc>, window_params = [{transform_indices = @transform_0, window_bounds = array<i64: 1, 16, 128>}, {pipeline_mode = #tpu.pipeline_mode<synchronous>, transform_indices = @transform_1, window_bounds = array<i64: 6, 128, 384>}, {pipeline_mode = #tpu.pipeline_mode<synchronous>, transform_indices = @transform_2, window_bounds = array<i64: 6, 1, 128>}, {pipeline_mode = #tpu.pipeline_mode<synchronous>, transform_indices = @transform_3, window_bounds = array<i64: 3, 128, 128>}, {pipeline_mode = #tpu.pipeline_mode<synchronous>, transform_indices = @transform_4, window_bounds = array<i64: 3, 128, 128>}, {pipeline_mode = #tpu.pipeline_mode<synchronous>, transform_indices = @transform_5, window_bounds = array<i64: 4, 128, 128>}, {pipeline_mode = #tpu.pipeline_mode<synchronous>, transform_indices = @transform_6, window_bounds = array<i64: 3, 1, 128>}, {transform_indices = @transform_7, window_bounds = array<i64: 1, 1, 128>}]} {
    %c0 = arith.constant 0 : index
    %c0_0 = arith.constant 0 : index
    %c0_1 = arith.constant 0 : index
    %0 = vector.load %arg1[%c0, %c0_0, %c0_1] : memref<1x16x128xf32, #tpu.memory_space<vmem>>, vector<1x16x128xf32>
    %1 = vector.shape_cast %0 : vector<1x16x128xf32> to vector<16x128xf32>
    %c0_2 = arith.constant 0 : index
    %c0_3 = arith.constant 0 : index
    %c0_4 = arith.constant 0 : index
    %2 = vector.load %arg2[%c0_2, %c0_3, %c0_4] : memref<6x128x384xf32, #tpu.memory_space<vmem>>, vector<1x128x384xf32>
    %3 = vector.shape_cast %2 : vector<1x128x384xf32> to vector<128x384xf32>
    %cst = arith.constant dense<0.000000e+00> : vector<16x384xf32>
    %4 = tpu.matmul %1, %3, %cst {dimension_numbers = #tpu.dot_dimension_numbers<[1], [0], [0], [1], [0, 0, 1, 1], [], []>} : vector<16x128xf32>, vector<128x384xf32>, vector<16x384xf32> -> vector<16x384xf32>
    %5 = vector.extract_strided_slice %4 {offsets = [0, 0], sizes = [16, 128], strides = [1, 1]} : vector<16x384xf32> to vector<16x128xf32>
    %6 = vector.extract_strided_slice %4 {offsets = [0, 128], sizes = [16, 128], strides = [1, 1]} : vector<16x384xf32> to vector<16x128xf32>
    %7 = vector.extract_strided_slice %4 {offsets = [0, 256], sizes = [16, 128], strides = [1, 1]} : vector<16x384xf32> to vector<16x128xf32>
    %8 = tpu.iota {dimensions = array<i32: 0>} : vector<16x16xi32>
    %9 = tpu.iota {dimensions = array<i32: 1>} : vector<16x16xi32>
    %c-1_i32 = arith.constant -1 : i32
    %10 = vector.broadcast %c-1_i32 : i32 to vector<16x16xi32>
    %11 = arith.addi %8, %10 : vector<16x16xi32>
    %12 = arith.cmpi eq, %9, %11 : vector<16x16xi32>
    %13 = arith.extui %12 : vector<16x16xi1> to vector<16x16xi32>
    %14 = arith.sitofp %13 : vector<16x16xi32> to vector<16x16xf32>
    %cst_5 = arith.constant dense<0.000000e+00> : vector<16x128xf32>
    %15 = tpu.matmul %14, %5, %cst_5 {dimension_numbers = #tpu.dot_dimension_numbers<[1], [0], [0], [1], [0, 0, 1, 1], [], []>} : vector<16x16xf32>, vector<16x128xf32>, vector<16x128xf32> -> vector<16x128xf32>
    %16 = arith.addf %15, %6 : vector<16x128xf32>
    %17 = tpu.iota {dimensions = array<i32: 0>} : vector<16x16xi32>
    %18 = tpu.iota {dimensions = array<i32: 1>} : vector<16x16xi32>
    %c1_i32 = arith.constant 1 : i32
    %19 = vector.broadcast %c1_i32 : i32 to vector<16x16xi32>
    %20 = arith.addi %17, %19 : vector<16x16xi32>
    %21 = arith.cmpi eq, %18, %20 : vector<16x16xi32>
    %22 = arith.extui %21 : vector<16x16xi1> to vector<16x16xi32>
    %23 = arith.sitofp %22 : vector<16x16xi32> to vector<16x16xf32>
    %cst_6 = arith.constant dense<0.000000e+00> : vector<16x128xf32>
    %24 = tpu.matmul %23, %7, %cst_6 {dimension_numbers = #tpu.dot_dimension_numbers<[1], [0], [0], [1], [0, 0, 1, 1], [], []>} : vector<16x16xf32>, vector<16x128xf32>, vector<16x128xf32> -> vector<16x128xf32>
    %25 = arith.addf %16, %24 : vector<16x128xf32>
    %c0_7 = arith.constant 0 : index
    %c0_8 = arith.constant 0 : index
    %c0_9 = arith.constant 0 : index
    %26 = vector.load %arg3[%c0_7, %c0_8, %c0_9] : memref<6x1x128xf32, #tpu.memory_space<vmem>>, vector<1x1x128xf32>
    %27 = vector.shape_cast %26 : vector<1x1x128xf32> to vector<1x128xf32>
    %28 = vector.broadcast %27 : vector<1x128xf32> to vector<16x128xf32>
    %29 = arith.addf %25, %28 : vector<16x128xf32>
    %cst_10 = arith.constant 0.000000e+00 : f32
    %30 = vector.broadcast %cst_10 : f32 to vector<16x128xf32>
    %31 = arith.maximumf %29, %30 : vector<16x128xf32>
    %c1 = arith.constant 1 : index
    %c0_11 = arith.constant 0 : index
    %c0_12 = arith.constant 0 : index
    %32 = vector.load %arg2[%c1, %c0_11, %c0_12] : memref<6x128x384xf32, #tpu.memory_space<vmem>>, vector<1x128x384xf32>
    %33 = vector.shape_cast %32 : vector<1x128x384xf32> to vector<128x384xf32>
    %cst_13 = arith.constant dense<0.000000e+00> : vector<16x384xf32>
    %34 = tpu.matmul %31, %33, %cst_13 {dimension_numbers = #tpu.dot_dimension_numbers<[1], [0], [0], [1], [0, 0, 1, 1], [], []>} : vector<16x128xf32>, vector<128x384xf32>, vector<16x384xf32> -> vector<16x384xf32>
    %35 = vector.extract_strided_slice %34 {offsets = [0, 0], sizes = [16, 128], strides = [1, 1]} : vector<16x384xf32> to vector<16x128xf32>
    %36 = vector.extract_strided_slice %34 {offsets = [0, 128], sizes = [16, 128], strides = [1, 1]} : vector<16x384xf32> to vector<16x128xf32>
    %37 = vector.extract_strided_slice %34 {offsets = [0, 256], sizes = [16, 128], strides = [1, 1]} : vector<16x384xf32> to vector<16x128xf32>
    %38 = tpu.iota {dimensions = array<i32: 0>} : vector<16x16xi32>
    %39 = tpu.iota {dimensions = array<i32: 1>} : vector<16x16xi32>
    %c-1_i32_14 = arith.constant -1 : i32
    %40 = vector.broadcast %c-1_i32_14 : i32 to vector<16x16xi32>
    %41 = arith.addi %38, %40 : vector<16x16xi32>
    %42 = arith.cmpi eq, %39, %41 : vector<16x16xi32>
    %43 = arith.extui %42 : vector<16x16xi1> to vector<16x16xi32>
    %44 = arith.sitofp %43 : vector<16x16xi32> to vector<16x16xf32>
    %cst_15 = arith.constant dense<0.000000e+00> : vector<16x128xf32>
    %45 = tpu.matmul %44, %35, %cst_15 {dimension_numbers = #tpu.dot_dimension_numbers<[1], [0], [0], [1], [0, 0, 1, 1], [], []>} : vector<16x16xf32>, vector<16x128xf32>, vector<16x128xf32> -> vector<16x128xf32>
    %46 = arith.addf %45, %36 : vector<16x128xf32>
    %47 = tpu.iota {dimensions = array<i32: 0>} : vector<16x16xi32>
    %48 = tpu.iota {dimensions = array<i32: 1>} : vector<16x16xi32>
    %c1_i32_16 = arith.constant 1 : i32
    %49 = vector.broadcast %c1_i32_16 : i32 to vector<16x16xi32>
    %50 = arith.addi %47, %49 : vector<16x16xi32>
    %51 = arith.cmpi eq, %48, %50 : vector<16x16xi32>
    %52 = arith.extui %51 : vector<16x16xi1> to vector<16x16xi32>
    %53 = arith.sitofp %52 : vector<16x16xi32> to vector<16x16xf32>
    %cst_17 = arith.constant dense<0.000000e+00> : vector<16x128xf32>
    %54 = tpu.matmul %53, %37, %cst_17 {dimension_numbers = #tpu.dot_dimension_numbers<[1], [0], [0], [1], [0, 0, 1, 1], [], []>} : vector<16x16xf32>, vector<16x128xf32>, vector<16x128xf32> -> vector<16x128xf32>
    %55 = arith.addf %46, %54 : vector<16x128xf32>
    %c1_18 = arith.constant 1 : index
    %c0_19 = arith.constant 0 : index
    %c0_20 = arith.constant 0 : index
    %56 = vector.load %arg3[%c1_18, %c0_19, %c0_20] : memref<6x1x128xf32, #tpu.memory_space<vmem>>, vector<1x1x128xf32>
    %57 = vector.shape_cast %56 : vector<1x1x128xf32> to vector<1x128xf32>
    %58 = vector.broadcast %57 : vector<1x128xf32> to vector<16x128xf32>
    %59 = arith.addf %55, %58 : vector<16x128xf32>
    %cst_21 = arith.constant 0.000000e+00 : f32
    %60 = vector.broadcast %cst_21 : f32 to vector<16x128xf32>
    %61 = arith.maximumf %59, %60 : vector<16x128xf32>
    %62 = tpu.iota {dimensions = array<i32: 0>} : vector<8x16xi32>
    %63 = tpu.iota {dimensions = array<i32: 1>} : vector<8x16xi32>
    %c2_i32 = arith.constant 2 : i32
    %64 = vector.broadcast %c2_i32 : i32 to vector<8x16xi32>
    %65 = arith.muli %64, %62 : vector<8x16xi32>
    %c0_i32 = arith.constant 0 : i32
    %66 = vector.broadcast %c0_i32 : i32 to vector<8x16xi32>
    %67 = arith.addi %65, %66 : vector<8x16xi32>
    %68 = arith.cmpi eq, %63, %67 : vector<8x16xi32>
    %69 = arith.extui %68 : vector<8x16xi1> to vector<8x16xi32>
    %70 = arith.sitofp %69 : vector<8x16xi32> to vector<8x16xf32>
    %cst_22 = arith.constant dense<0.000000e+00> : vector<8x128xf32>
    %71 = tpu.matmul %70, %61, %cst_22 {dimension_numbers = #tpu.dot_dimension_numbers<[1], [0], [0], [1], [0, 0, 1, 1], [], []>} : vector<8x16xf32>, vector<16x128xf32>, vector<8x128xf32> -> vector<8x128xf32>
    %72 = tpu.iota {dimensions = array<i32: 0>} : vector<8x16xi32>
    %73 = tpu.iota {dimensions = array<i32: 1>} : vector<8x16xi32>
    %c2_i32_23 = arith.constant 2 : i32
    %74 = vector.broadcast %c2_i32_23 : i32 to vector<8x16xi32>
    %75 = arith.muli %74, %72 : vector<8x16xi32>
    %c1_i32_24 = arith.constant 1 : i32
    %76 = vector.broadcast %c1_i32_24 : i32 to vector<8x16xi32>
    %77 = arith.addi %75, %76 : vector<8x16xi32>
    %78 = arith.cmpi eq, %73, %77 : vector<8x16xi32>
    %79 = arith.extui %78 : vector<8x16xi1> to vector<8x16xi32>
    %80 = arith.sitofp %79 : vector<8x16xi32> to vector<8x16xf32>
    %cst_25 = arith.constant dense<0.000000e+00> : vector<8x128xf32>
    %81 = tpu.matmul %80, %61, %cst_25 {dimension_numbers = #tpu.dot_dimension_numbers<[1], [0], [0], [1], [0, 0, 1, 1], [], []>} : vector<8x16xf32>, vector<16x128xf32>, vector<8x128xf32> -> vector<8x128xf32>
    %82 = arith.maximumf %71, %81 : vector<8x128xf32>
    %c0_26 = arith.constant 0 : index
    %c0_27 = arith.constant 0 : index
    %c0_28 = arith.constant 0 : index
    %83 = vector.load %arg4[%c0_26, %c0_27, %c0_28] : memref<3x128x128xf32, #tpu.memory_space<vmem>>, vector<1x128x128xf32>
    %84 = vector.shape_cast %83 : vector<1x128x128xf32> to vector<128x128xf32>
    %cst_29 = arith.constant dense<0.000000e+00> : vector<8x128xf32>
    %85 = tpu.matmul %82, %84, %cst_29 {dimension_numbers = #tpu.dot_dimension_numbers<[1], [0], [0], [1], [0, 0, 1, 1], [], []>} : vector<8x128xf32>, vector<128x128xf32>, vector<8x128xf32> -> vector<8x128xf32>
    %c0_30 = arith.constant 0 : index
    %c0_31 = arith.constant 0 : index
    %c0_32 = arith.constant 0 : index
    %86 = vector.load %arg5[%c0_30, %c0_31, %c0_32] : memref<3x128x128xf32, #tpu.memory_space<vmem>>, vector<1x128x128xf32>
    %87 = vector.shape_cast %86 : vector<1x128x128xf32> to vector<128x128xf32>
    %cst_33 = arith.constant dense<0.000000e+00> : vector<8x128xf32>
    %88 = tpu.matmul %82, %87, %cst_33 {dimension_numbers = #tpu.dot_dimension_numbers<[1], [0], [0], [1], [0, 0, 1, 1], [], []>} : vector<8x128xf32>, vector<128x128xf32>, vector<8x128xf32> -> vector<8x128xf32>
    %89 = arith.maximumf %85, %88 : vector<8x128xf32>
    %c2 = arith.constant 2 : index
    %c0_34 = arith.constant 0 : index
    %c0_35 = arith.constant 0 : index
    %90 = vector.load %arg2[%c2, %c0_34, %c0_35] : memref<6x128x384xf32, #tpu.memory_space<vmem>>, vector<1x128x384xf32>
    %91 = vector.shape_cast %90 : vector<1x128x384xf32> to vector<128x384xf32>
    %cst_36 = arith.constant dense<0.000000e+00> : vector<8x384xf32>
    %92 = tpu.matmul %89, %91, %cst_36 {dimension_numbers = #tpu.dot_dimension_numbers<[1], [0], [0], [1], [0, 0, 1, 1], [], []>} : vector<8x128xf32>, vector<128x384xf32>, vector<8x384xf32> -> vector<8x384xf32>
    %93 = vector.extract_strided_slice %92 {offsets = [0, 0], sizes = [8, 128], strides = [1, 1]} : vector<8x384xf32> to vector<8x128xf32>
    %94 = vector.extract_strided_slice %92 {offsets = [0, 128], sizes = [8, 128], strides = [1, 1]} : vector<8x384xf32> to vector<8x128xf32>
    %95 = vector.extract_strided_slice %92 {offsets = [0, 256], sizes = [8, 128], strides = [1, 1]} : vector<8x384xf32> to vector<8x128xf32>
    %96 = tpu.iota {dimensions = array<i32: 0>} : vector<8x8xi32>
    %97 = tpu.iota {dimensions = array<i32: 1>} : vector<8x8xi32>
    %c-1_i32_37 = arith.constant -1 : i32
    %98 = vector.broadcast %c-1_i32_37 : i32 to vector<8x8xi32>
    %99 = arith.addi %96, %98 : vector<8x8xi32>
    %100 = arith.cmpi eq, %97, %99 : vector<8x8xi32>
    %101 = arith.extui %100 : vector<8x8xi1> to vector<8x8xi32>
    %102 = arith.sitofp %101 : vector<8x8xi32> to vector<8x8xf32>
    %cst_38 = arith.constant dense<0.000000e+00> : vector<8x128xf32>
    %103 = tpu.matmul %102, %93, %cst_38 {dimension_numbers = #tpu.dot_dimension_numbers<[1], [0], [0], [1], [0, 0, 1, 1], [], []>} : vector<8x8xf32>, vector<8x128xf32>, vector<8x128xf32> -> vector<8x128xf32>
    %104 = arith.addf %103, %94 : vector<8x128xf32>
    %105 = tpu.iota {dimensions = array<i32: 0>} : vector<8x8xi32>
    %106 = tpu.iota {dimensions = array<i32: 1>} : vector<8x8xi32>
    %c1_i32_39 = arith.constant 1 : i32
    %107 = vector.broadcast %c1_i32_39 : i32 to vector<8x8xi32>
    %108 = arith.addi %105, %107 : vector<8x8xi32>
    %109 = arith.cmpi eq, %106, %108 : vector<8x8xi32>
    %110 = arith.extui %109 : vector<8x8xi1> to vector<8x8xi32>
    %111 = arith.sitofp %110 : vector<8x8xi32> to vector<8x8xf32>
    %cst_40 = arith.constant dense<0.000000e+00> : vector<8x128xf32>
    %112 = tpu.matmul %111, %95, %cst_40 {dimension_numbers = #tpu.dot_dimension_numbers<[1], [0], [0], [1], [0, 0, 1, 1], [], []>} : vector<8x8xf32>, vector<8x128xf32>, vector<8x128xf32> -> vector<8x128xf32>
    %113 = arith.addf %104, %112 : vector<8x128xf32>
    %c2_41 = arith.constant 2 : index
    %c0_42 = arith.constant 0 : index
    %c0_43 = arith.constant 0 : index
    %114 = vector.load %arg3[%c2_41, %c0_42, %c0_43] : memref<6x1x128xf32, #tpu.memory_space<vmem>>, vector<1x1x128xf32>
    %115 = vector.shape_cast %114 : vector<1x1x128xf32> to vector<1x128xf32>
    %116 = vector.broadcast %115 : vector<1x128xf32> to vector<8x128xf32>
    %117 = arith.addf %113, %116 : vector<8x128xf32>
    %cst_44 = arith.constant 0.000000e+00 : f32
    %118 = vector.broadcast %cst_44 : f32 to vector<8x128xf32>
    %119 = arith.maximumf %117, %118 : vector<8x128xf32>
    %c3 = arith.constant 3 : index
    %c0_45 = arith.constant 0 : index
    %c0_46 = arith.constant 0 : index
    %120 = vector.load %arg2[%c3, %c0_45, %c0_46] : memref<6x128x384xf32, #tpu.memory_space<vmem>>, vector<1x128x384xf32>
    %121 = vector.shape_cast %120 : vector<1x128x384xf32> to vector<128x384xf32>
    %cst_47 = arith.constant dense<0.000000e+00> : vector<8x384xf32>
    %122 = tpu.matmul %119, %121, %cst_47 {dimension_numbers = #tpu.dot_dimension_numbers<[1], [0], [0], [1], [0, 0, 1, 1], [], []>} : vector<8x128xf32>, vector<128x384xf32>, vector<8x384xf32> -> vector<8x384xf32>
    %123 = vector.extract_strided_slice %122 {offsets = [0, 0], sizes = [8, 128], strides = [1, 1]} : vector<8x384xf32> to vector<8x128xf32>
    %124 = vector.extract_strided_slice %122 {offsets = [0, 128], sizes = [8, 128], strides = [1, 1]} : vector<8x384xf32> to vector<8x128xf32>
    %125 = vector.extract_strided_slice %122 {offsets = [0, 256], sizes = [8, 128], strides = [1, 1]} : vector<8x384xf32> to vector<8x128xf32>
    %126 = tpu.iota {dimensions = array<i32: 0>} : vector<8x8xi32>
    %127 = tpu.iota {dimensions = array<i32: 1>} : vector<8x8xi32>
    %c-1_i32_48 = arith.constant -1 : i32
    %128 = vector.broadcast %c-1_i32_48 : i32 to vector<8x8xi32>
    %129 = arith.addi %126, %128 : vector<8x8xi32>
    %130 = arith.cmpi eq, %127, %129 : vector<8x8xi32>
    %131 = arith.extui %130 : vector<8x8xi1> to vector<8x8xi32>
    %132 = arith.sitofp %131 : vector<8x8xi32> to vector<8x8xf32>
    %cst_49 = arith.constant dense<0.000000e+00> : vector<8x128xf32>
    %133 = tpu.matmul %132, %123, %cst_49 {dimension_numbers = #tpu.dot_dimension_numbers<[1], [0], [0], [1], [0, 0, 1, 1], [], []>} : vector<8x8xf32>, vector<8x128xf32>, vector<8x128xf32> -> vector<8x128xf32>
    %134 = arith.addf %133, %124 : vector<8x128xf32>
    %135 = tpu.iota {dimensions = array<i32: 0>} : vector<8x8xi32>
    %136 = tpu.iota {dimensions = array<i32: 1>} : vector<8x8xi32>
    %c1_i32_50 = arith.constant 1 : i32
    %137 = vector.broadcast %c1_i32_50 : i32 to vector<8x8xi32>
    %138 = arith.addi %135, %137 : vector<8x8xi32>
    %139 = arith.cmpi eq, %136, %138 : vector<8x8xi32>
    %140 = arith.extui %139 : vector<8x8xi1> to vector<8x8xi32>
    %141 = arith.sitofp %140 : vector<8x8xi32> to vector<8x8xf32>
    %cst_51 = arith.constant dense<0.000000e+00> : vector<8x128xf32>
    %142 = tpu.matmul %141, %125, %cst_51 {dimension_numbers = #tpu.dot_dimension_numbers<[1], [0], [0], [1], [0, 0, 1, 1], [], []>} : vector<8x8xf32>, vector<8x128xf32>, vector<8x128xf32> -> vector<8x128xf32>
    %143 = arith.addf %134, %142 : vector<8x128xf32>
    %c3_52 = arith.constant 3 : index
    %c0_53 = arith.constant 0 : index
    %c0_54 = arith.constant 0 : index
    %144 = vector.load %arg3[%c3_52, %c0_53, %c0_54] : memref<6x1x128xf32, #tpu.memory_space<vmem>>, vector<1x1x128xf32>
    %145 = vector.shape_cast %144 : vector<1x1x128xf32> to vector<1x128xf32>
    %146 = vector.broadcast %145 : vector<1x128xf32> to vector<8x128xf32>
    %147 = arith.addf %143, %146 : vector<8x128xf32>
    %cst_55 = arith.constant 0.000000e+00 : f32
    %148 = vector.broadcast %cst_55 : f32 to vector<8x128xf32>
    %149 = arith.maximumf %147, %148 : vector<8x128xf32>
    %150 = tpu.iota {dimensions = array<i32: 0>} : vector<4x8xi32>
    %151 = tpu.iota {dimensions = array<i32: 1>} : vector<4x8xi32>
    %c2_i32_56 = arith.constant 2 : i32
    %152 = vector.broadcast %c2_i32_56 : i32 to vector<4x8xi32>
    %153 = arith.muli %152, %150 : vector<4x8xi32>
    %c0_i32_57 = arith.constant 0 : i32
    %154 = vector.broadcast %c0_i32_57 : i32 to vector<4x8xi32>
    %155 = arith.addi %153, %154 : vector<4x8xi32>
    %156 = arith.cmpi eq, %151, %155 : vector<4x8xi32>
    %157 = arith.extui %156 : vector<4x8xi1> to vector<4x8xi32>
    %158 = arith.sitofp %157 : vector<4x8xi32> to vector<4x8xf32>
    %cst_58 = arith.constant dense<0.000000e+00> : vector<4x128xf32>
    %159 = tpu.matmul %158, %149, %cst_58 {dimension_numbers = #tpu.dot_dimension_numbers<[1], [0], [0], [1], [0, 0, 1, 1], [], []>} : vector<4x8xf32>, vector<8x128xf32>, vector<4x128xf32> -> vector<4x128xf32>
    %160 = tpu.iota {dimensions = array<i32: 0>} : vector<4x8xi32>
    %161 = tpu.iota {dimensions = array<i32: 1>} : vector<4x8xi32>
    %c2_i32_59 = arith.constant 2 : i32
    %162 = vector.broadcast %c2_i32_59 : i32 to vector<4x8xi32>
    %163 = arith.muli %162, %160 : vector<4x8xi32>
    %c1_i32_60 = arith.constant 1 : i32
    %164 = vector.broadcast %c1_i32_60 : i32 to vector<4x8xi32>
    %165 = arith.addi %163, %164 : vector<4x8xi32>
    %166 = arith.cmpi eq, %161, %165 : vector<4x8xi32>
    %167 = arith.extui %166 : vector<4x8xi1> to vector<4x8xi32>
    %168 = arith.sitofp %167 : vector<4x8xi32> to vector<4x8xf32>
    %cst_61 = arith.constant dense<0.000000e+00> : vector<4x128xf32>
    %169 = tpu.matmul %168, %149, %cst_61 {dimension_numbers = #tpu.dot_dimension_numbers<[1], [0], [0], [1], [0, 0, 1, 1], [], []>} : vector<4x8xf32>, vector<8x128xf32>, vector<4x128xf32> -> vector<4x128xf32>
    %170 = arith.maximumf %159, %169 : vector<4x128xf32>
    %c1_62 = arith.constant 1 : index
    %c0_63 = arith.constant 0 : index
    %c0_64 = arith.constant 0 : index
    %171 = vector.load %arg4[%c1_62, %c0_63, %c0_64] : memref<3x128x128xf32, #tpu.memory_space<vmem>>, vector<1x128x128xf32>
    %172 = vector.shape_cast %171 : vector<1x128x128xf32> to vector<128x128xf32>
    %cst_65 = arith.constant dense<0.000000e+00> : vector<4x128xf32>
    %173 = tpu.matmul %170, %172, %cst_65 {dimension_numbers = #tpu.dot_dimension_numbers<[1], [0], [0], [1], [0, 0, 1, 1], [], []>} : vector<4x128xf32>, vector<128x128xf32>, vector<4x128xf32> -> vector<4x128xf32>
    %c1_66 = arith.constant 1 : index
    %c0_67 = arith.constant 0 : index
    %c0_68 = arith.constant 0 : index
    %174 = vector.load %arg5[%c1_66, %c0_67, %c0_68] : memref<3x128x128xf32, #tpu.memory_space<vmem>>, vector<1x128x128xf32>
    %175 = vector.shape_cast %174 : vector<1x128x128xf32> to vector<128x128xf32>
    %cst_69 = arith.constant dense<0.000000e+00> : vector<4x128xf32>
    %176 = tpu.matmul %170, %175, %cst_69 {dimension_numbers = #tpu.dot_dimension_numbers<[1], [0], [0], [1], [0, 0, 1, 1], [], []>} : vector<4x128xf32>, vector<128x128xf32>, vector<4x128xf32> -> vector<4x128xf32>
    %177 = arith.maximumf %173, %176 : vector<4x128xf32>
    %c4 = arith.constant 4 : index
    %c0_70 = arith.constant 0 : index
    %c0_71 = arith.constant 0 : index
    %178 = vector.load %arg2[%c4, %c0_70, %c0_71] : memref<6x128x384xf32, #tpu.memory_space<vmem>>, vector<1x128x384xf32>
    %179 = vector.shape_cast %178 : vector<1x128x384xf32> to vector<128x384xf32>
    %cst_72 = arith.constant dense<0.000000e+00> : vector<4x384xf32>
    %180 = tpu.matmul %177, %179, %cst_72 {dimension_numbers = #tpu.dot_dimension_numbers<[1], [0], [0], [1], [0, 0, 1, 1], [], []>} : vector<4x128xf32>, vector<128x384xf32>, vector<4x384xf32> -> vector<4x384xf32>
    %181 = vector.extract_strided_slice %180 {offsets = [0, 0], sizes = [4, 128], strides = [1, 1]} : vector<4x384xf32> to vector<4x128xf32>
    %182 = vector.extract_strided_slice %180 {offsets = [0, 128], sizes = [4, 128], strides = [1, 1]} : vector<4x384xf32> to vector<4x128xf32>
    %183 = vector.extract_strided_slice %180 {offsets = [0, 256], sizes = [4, 128], strides = [1, 1]} : vector<4x384xf32> to vector<4x128xf32>
    %184 = tpu.iota {dimensions = array<i32: 0>} : vector<4x4xi32>
    %185 = tpu.iota {dimensions = array<i32: 1>} : vector<4x4xi32>
    %c-1_i32_73 = arith.constant -1 : i32
    %186 = vector.broadcast %c-1_i32_73 : i32 to vector<4x4xi32>
    %187 = arith.addi %184, %186 : vector<4x4xi32>
    %188 = arith.cmpi eq, %185, %187 : vector<4x4xi32>
    %189 = arith.extui %188 : vector<4x4xi1> to vector<4x4xi32>
    %190 = arith.sitofp %189 : vector<4x4xi32> to vector<4x4xf32>
    %cst_74 = arith.constant dense<0.000000e+00> : vector<4x128xf32>
    %191 = tpu.matmul %190, %181, %cst_74 {dimension_numbers = #tpu.dot_dimension_numbers<[1], [0], [0], [1], [0, 0, 1, 1], [], []>} : vector<4x4xf32>, vector<4x128xf32>, vector<4x128xf32> -> vector<4x128xf32>
    %192 = arith.addf %191, %182 : vector<4x128xf32>
    %193 = tpu.iota {dimensions = array<i32: 0>} : vector<4x4xi32>
    %194 = tpu.iota {dimensions = array<i32: 1>} : vector<4x4xi32>
    %c1_i32_75 = arith.constant 1 : i32
    %195 = vector.broadcast %c1_i32_75 : i32 to vector<4x4xi32>
    %196 = arith.addi %193, %195 : vector<4x4xi32>
    %197 = arith.cmpi eq, %194, %196 : vector<4x4xi32>
    %198 = arith.extui %197 : vector<4x4xi1> to vector<4x4xi32>
    %199 = arith.sitofp %198 : vector<4x4xi32> to vector<4x4xf32>
    %cst_76 = arith.constant dense<0.000000e+00> : vector<4x128xf32>
    %200 = tpu.matmul %199, %183, %cst_76 {dimension_numbers = #tpu.dot_dimension_numbers<[1], [0], [0], [1], [0, 0, 1, 1], [], []>} : vector<4x4xf32>, vector<4x128xf32>, vector<4x128xf32> -> vector<4x128xf32>
    %201 = arith.addf %192, %200 : vector<4x128xf32>
    %c4_77 = arith.constant 4 : index
    %c0_78 = arith.constant 0 : index
    %c0_79 = arith.constant 0 : index
    %202 = vector.load %arg3[%c4_77, %c0_78, %c0_79] : memref<6x1x128xf32, #tpu.memory_space<vmem>>, vector<1x1x128xf32>
    %203 = vector.shape_cast %202 : vector<1x1x128xf32> to vector<1x128xf32>
    %204 = vector.broadcast %203 : vector<1x128xf32> to vector<4x128xf32>
    %205 = arith.addf %201, %204 : vector<4x128xf32>
    %cst_80 = arith.constant 0.000000e+00 : f32
    %206 = vector.broadcast %cst_80 : f32 to vector<4x128xf32>
    %207 = arith.maximumf %205, %206 : vector<4x128xf32>
    %c5 = arith.constant 5 : index
    %c0_81 = arith.constant 0 : index
    %c0_82 = arith.constant 0 : index
    %208 = vector.load %arg2[%c5, %c0_81, %c0_82] : memref<6x128x384xf32, #tpu.memory_space<vmem>>, vector<1x128x384xf32>
    %209 = vector.shape_cast %208 : vector<1x128x384xf32> to vector<128x384xf32>
    %cst_83 = arith.constant dense<0.000000e+00> : vector<4x384xf32>
    %210 = tpu.matmul %207, %209, %cst_83 {dimension_numbers = #tpu.dot_dimension_numbers<[1], [0], [0], [1], [0, 0, 1, 1], [], []>} : vector<4x128xf32>, vector<128x384xf32>, vector<4x384xf32> -> vector<4x384xf32>
    %211 = vector.extract_strided_slice %210 {offsets = [0, 0], sizes = [4, 128], strides = [1, 1]} : vector<4x384xf32> to vector<4x128xf32>
    %212 = vector.extract_strided_slice %210 {offsets = [0, 128], sizes = [4, 128], strides = [1, 1]} : vector<4x384xf32> to vector<4x128xf32>
    %213 = vector.extract_strided_slice %210 {offsets = [0, 256], sizes = [4, 128], strides = [1, 1]} : vector<4x384xf32> to vector<4x128xf32>
    %214 = tpu.iota {dimensions = array<i32: 0>} : vector<4x4xi32>
    %215 = tpu.iota {dimensions = array<i32: 1>} : vector<4x4xi32>
    %c-1_i32_84 = arith.constant -1 : i32
    %216 = vector.broadcast %c-1_i32_84 : i32 to vector<4x4xi32>
    %217 = arith.addi %214, %216 : vector<4x4xi32>
    %218 = arith.cmpi eq, %215, %217 : vector<4x4xi32>
    %219 = arith.extui %218 : vector<4x4xi1> to vector<4x4xi32>
    %220 = arith.sitofp %219 : vector<4x4xi32> to vector<4x4xf32>
    %cst_85 = arith.constant dense<0.000000e+00> : vector<4x128xf32>
    %221 = tpu.matmul %220, %211, %cst_85 {dimension_numbers = #tpu.dot_dimension_numbers<[1], [0], [0], [1], [0, 0, 1, 1], [], []>} : vector<4x4xf32>, vector<4x128xf32>, vector<4x128xf32> -> vector<4x128xf32>
    %222 = arith.addf %221, %212 : vector<4x128xf32>
    %223 = tpu.iota {dimensions = array<i32: 0>} : vector<4x4xi32>
    %224 = tpu.iota {dimensions = array<i32: 1>} : vector<4x4xi32>
    %c1_i32_86 = arith.constant 1 : i32
    %225 = vector.broadcast %c1_i32_86 : i32 to vector<4x4xi32>
    %226 = arith.addi %223, %225 : vector<4x4xi32>
    %227 = arith.cmpi eq, %224, %226 : vector<4x4xi32>
    %228 = arith.extui %227 : vector<4x4xi1> to vector<4x4xi32>
    %229 = arith.sitofp %228 : vector<4x4xi32> to vector<4x4xf32>
    %cst_87 = arith.constant dense<0.000000e+00> : vector<4x128xf32>
    %230 = tpu.matmul %229, %213, %cst_87 {dimension_numbers = #tpu.dot_dimension_numbers<[1], [0], [0], [1], [0, 0, 1, 1], [], []>} : vector<4x4xf32>, vector<4x128xf32>, vector<4x128xf32> -> vector<4x128xf32>
    %231 = arith.addf %222, %230 : vector<4x128xf32>
    %c5_88 = arith.constant 5 : index
    %c0_89 = arith.constant 0 : index
    %c0_90 = arith.constant 0 : index
    %232 = vector.load %arg3[%c5_88, %c0_89, %c0_90] : memref<6x1x128xf32, #tpu.memory_space<vmem>>, vector<1x1x128xf32>
    %233 = vector.shape_cast %232 : vector<1x1x128xf32> to vector<1x128xf32>
    %234 = vector.broadcast %233 : vector<1x128xf32> to vector<4x128xf32>
    %235 = arith.addf %231, %234 : vector<4x128xf32>
    %cst_91 = arith.constant 0.000000e+00 : f32
    %236 = vector.broadcast %cst_91 : f32 to vector<4x128xf32>
    %237 = arith.maximumf %235, %236 : vector<4x128xf32>
    %238 = tpu.iota {dimensions = array<i32: 0>} : vector<2x4xi32>
    %239 = tpu.iota {dimensions = array<i32: 1>} : vector<2x4xi32>
    %c2_i32_92 = arith.constant 2 : i32
    %240 = vector.broadcast %c2_i32_92 : i32 to vector<2x4xi32>
    %241 = arith.muli %240, %238 : vector<2x4xi32>
    %c0_i32_93 = arith.constant 0 : i32
    %242 = vector.broadcast %c0_i32_93 : i32 to vector<2x4xi32>
    %243 = arith.addi %241, %242 : vector<2x4xi32>
    %244 = arith.cmpi eq, %239, %243 : vector<2x4xi32>
    %245 = arith.extui %244 : vector<2x4xi1> to vector<2x4xi32>
    %246 = arith.sitofp %245 : vector<2x4xi32> to vector<2x4xf32>
    %cst_94 = arith.constant dense<0.000000e+00> : vector<2x128xf32>
    %247 = tpu.matmul %246, %237, %cst_94 {dimension_numbers = #tpu.dot_dimension_numbers<[1], [0], [0], [1], [0, 0, 1, 1], [], []>} : vector<2x4xf32>, vector<4x128xf32>, vector<2x128xf32> -> vector<2x128xf32>
    %248 = tpu.iota {dimensions = array<i32: 0>} : vector<2x4xi32>
    %249 = tpu.iota {dimensions = array<i32: 1>} : vector<2x4xi32>
    %c2_i32_95 = arith.constant 2 : i32
    %250 = vector.broadcast %c2_i32_95 : i32 to vector<2x4xi32>
    %251 = arith.muli %250, %248 : vector<2x4xi32>
    %c1_i32_96 = arith.constant 1 : i32
    %252 = vector.broadcast %c1_i32_96 : i32 to vector<2x4xi32>
    %253 = arith.addi %251, %252 : vector<2x4xi32>
    %254 = arith.cmpi eq, %249, %253 : vector<2x4xi32>
    %255 = arith.extui %254 : vector<2x4xi1> to vector<2x4xi32>
    %256 = arith.sitofp %255 : vector<2x4xi32> to vector<2x4xf32>
    %cst_97 = arith.constant dense<0.000000e+00> : vector<2x128xf32>
    %257 = tpu.matmul %256, %237, %cst_97 {dimension_numbers = #tpu.dot_dimension_numbers<[1], [0], [0], [1], [0, 0, 1, 1], [], []>} : vector<2x4xf32>, vector<4x128xf32>, vector<2x128xf32> -> vector<2x128xf32>
    %258 = arith.maximumf %247, %257 : vector<2x128xf32>
    %c2_98 = arith.constant 2 : index
    %c0_99 = arith.constant 0 : index
    %c0_100 = arith.constant 0 : index
    %259 = vector.load %arg4[%c2_98, %c0_99, %c0_100] : memref<3x128x128xf32, #tpu.memory_space<vmem>>, vector<1x128x128xf32>
    %260 = vector.shape_cast %259 : vector<1x128x128xf32> to vector<128x128xf32>
    %cst_101 = arith.constant dense<0.000000e+00> : vector<2x128xf32>
    %261 = tpu.matmul %258, %260, %cst_101 {dimension_numbers = #tpu.dot_dimension_numbers<[1], [0], [0], [1], [0, 0, 1, 1], [], []>} : vector<2x128xf32>, vector<128x128xf32>, vector<2x128xf32> -> vector<2x128xf32>
    %c2_102 = arith.constant 2 : index
    %c0_103 = arith.constant 0 : index
    %c0_104 = arith.constant 0 : index
    %262 = vector.load %arg5[%c2_102, %c0_103, %c0_104] : memref<3x128x128xf32, #tpu.memory_space<vmem>>, vector<1x128x128xf32>
    %263 = vector.shape_cast %262 : vector<1x128x128xf32> to vector<128x128xf32>
    %cst_105 = arith.constant dense<0.000000e+00> : vector<2x128xf32>
    %264 = tpu.matmul %258, %263, %cst_105 {dimension_numbers = #tpu.dot_dimension_numbers<[1], [0], [0], [1], [0, 0, 1, 1], [], []>} : vector<2x128xf32>, vector<128x128xf32>, vector<2x128xf32> -> vector<2x128xf32>
    %265 = arith.maximumf %261, %264 : vector<2x128xf32>
    %266 = vector.extract_strided_slice %265 {offsets = [0, 0], sizes = [1, 128], strides = [1, 1]} : vector<2x128xf32> to vector<1x128xf32>
    %267 = vector.extract_strided_slice %265 {offsets = [1, 0], sizes = [1, 128], strides = [1, 1]} : vector<2x128xf32> to vector<1x128xf32>
    %c0_106 = arith.constant 0 : index
    %c0_107 = arith.constant 0 : index
    %c0_108 = arith.constant 0 : index
    %268 = vector.load %arg6[%c0_106, %c0_107, %c0_108] : memref<4x128x128xf32, #tpu.memory_space<vmem>>, vector<1x128x128xf32>
    %269 = vector.shape_cast %268 : vector<1x128x128xf32> to vector<128x128xf32>
    %cst_109 = arith.constant dense<0.000000e+00> : vector<1x128xf32>
    %270 = tpu.matmul %266, %269, %cst_109 {dimension_numbers = #tpu.dot_dimension_numbers<[1], [0], [0], [1], [0, 0, 1, 1], [], []>} : vector<1x128xf32>, vector<128x128xf32>, vector<1x128xf32> -> vector<1x128xf32>
    %c1_110 = arith.constant 1 : index
    %c0_111 = arith.constant 0 : index
    %c0_112 = arith.constant 0 : index
    %271 = vector.load %arg6[%c1_110, %c0_111, %c0_112] : memref<4x128x128xf32, #tpu.memory_space<vmem>>, vector<1x128x128xf32>
    %272 = vector.shape_cast %271 : vector<1x128x128xf32> to vector<128x128xf32>
    %cst_113 = arith.constant dense<0.000000e+00> : vector<1x128xf32>
    %273 = tpu.matmul %267, %272, %cst_113 {dimension_numbers = #tpu.dot_dimension_numbers<[1], [0], [0], [1], [0, 0, 1, 1], [], []>} : vector<1x128xf32>, vector<128x128xf32>, vector<1x128xf32> -> vector<1x128xf32>
    %274 = arith.addf %270, %273 : vector<1x128xf32>
    %c0_114 = arith.constant 0 : index
    %c0_115 = arith.constant 0 : index
    %c0_116 = arith.constant 0 : index
    %275 = vector.load %arg7[%c0_114, %c0_115, %c0_116] : memref<3x1x128xf32, #tpu.memory_space<vmem>>, vector<1x1x128xf32>
    %276 = vector.shape_cast %275 : vector<1x1x128xf32> to vector<1x128xf32>
    %277 = arith.addf %274, %276 : vector<1x128xf32>
    %cst_117 = arith.constant 0.000000e+00 : f32
    %278 = vector.broadcast %cst_117 : f32 to vector<1x128xf32>
    %279 = arith.maximumf %277, %278 : vector<1x128xf32>
    %c2_118 = arith.constant 2 : index
    %c0_119 = arith.constant 0 : index
    %c0_120 = arith.constant 0 : index
    %280 = vector.load %arg6[%c2_118, %c0_119, %c0_120] : memref<4x128x128xf32, #tpu.memory_space<vmem>>, vector<1x128x128xf32>
    %281 = vector.shape_cast %280 : vector<1x128x128xf32> to vector<128x128xf32>
    %cst_121 = arith.constant dense<0.000000e+00> : vector<1x128xf32>
    %282 = tpu.matmul %279, %281, %cst_121 {dimension_numbers = #tpu.dot_dimension_numbers<[1], [0], [0], [1], [0, 0, 1, 1], [], []>} : vector<1x128xf32>, vector<128x128xf32>, vector<1x128xf32> -> vector<1x128xf32>
    %c1_122 = arith.constant 1 : index
    %c0_123 = arith.constant 0 : index
    %c0_124 = arith.constant 0 : index
    %283 = vector.load %arg7[%c1_122, %c0_123, %c0_124] : memref<3x1x128xf32, #tpu.memory_space<vmem>>, vector<1x1x128xf32>
    %284 = vector.shape_cast %283 : vector<1x1x128xf32> to vector<1x128xf32>
    %285 = arith.addf %282, %284 : vector<1x128xf32>
    %cst_125 = arith.constant 0.000000e+00 : f32
    %286 = vector.broadcast %cst_125 : f32 to vector<1x128xf32>
    %287 = arith.maximumf %285, %286 : vector<1x128xf32>
    %c3_126 = arith.constant 3 : index
    %c0_127 = arith.constant 0 : index
    %c0_128 = arith.constant 0 : index
    %288 = vector.load %arg6[%c3_126, %c0_127, %c0_128] : memref<4x128x128xf32, #tpu.memory_space<vmem>>, vector<1x128x128xf32>
    %289 = vector.shape_cast %288 : vector<1x128x128xf32> to vector<128x128xf32>
    %cst_129 = arith.constant dense<0.000000e+00> : vector<1x128xf32>
    %290 = tpu.matmul %287, %289, %cst_129 {dimension_numbers = #tpu.dot_dimension_numbers<[1], [0], [0], [1], [0, 0, 1, 1], [], []>} : vector<1x128xf32>, vector<128x128xf32>, vector<1x128xf32> -> vector<1x128xf32>
    %c2_130 = arith.constant 2 : index
    %c0_131 = arith.constant 0 : index
    %c0_132 = arith.constant 0 : index
    %291 = vector.load %arg7[%c2_130, %c0_131, %c0_132] : memref<3x1x128xf32, #tpu.memory_space<vmem>>, vector<1x1x128xf32>
    %292 = vector.shape_cast %291 : vector<1x1x128xf32> to vector<1x128xf32>
    %293 = arith.addf %290, %292 : vector<1x128xf32>
    %c0_133 = arith.constant 0 : index
    %c0_134 = arith.constant 0 : index
    %c0_135 = arith.constant 0 : index
    %294 = vector.load %arg8[%c0_133, %c0_134, %c0_135] : memref<1x1x128xf32, #tpu.memory_space<vmem>>, vector<1x1x128xf32>
    %295 = vector.shape_cast %294 : vector<1x1x128xf32> to vector<1x128xf32>
    %296 = vector.shape_cast %293 : vector<1x128xf32> to vector<1x1x128xf32>
    tpu.vector_store %arg8[%c0_133, %c0_134, %c0_135], %296 {strides = array<i32>} : memref<1x1x128xf32, #tpu.memory_space<vmem>>, vector<1x1x128xf32>,
    return
  }
  func.func @transform_0(%arg0: i32) -> (i32, i32, i32) {
    %c0_i32 = arith.constant 0 : i32
    %c0_i32_0 = arith.constant 0 : i32
    %c0_i32_1 = arith.constant 0 : i32
    return %arg0, %c0_i32, %c0_i32_0 : i32, i32, i32
  }
  func.func @transform_1(%arg0: i32) -> (i32, i32, i32) {
    %c0_i32 = arith.constant 0 : i32
    %c0_i32_0 = arith.constant 0 : i32
    %c0_i32_1 = arith.constant 0 : i32
    %c0_i32_2 = arith.constant 0 : i32
    return %c0_i32, %c0_i32_0, %c0_i32_1 : i32, i32, i32
  }
  func.func @transform_2(%arg0: i32) -> (i32, i32, i32) {
    %c0_i32 = arith.constant 0 : i32
    %c0_i32_0 = arith.constant 0 : i32
    %c0_i32_1 = arith.constant 0 : i32
    %c0_i32_2 = arith.constant 0 : i32
    return %c0_i32, %c0_i32_0, %c0_i32_1 : i32, i32, i32
  }
  func.func @transform_3(%arg0: i32) -> (i32, i32, i32) {
    %c0_i32 = arith.constant 0 : i32
    %c0_i32_0 = arith.constant 0 : i32
    %c0_i32_1 = arith.constant 0 : i32
    %c0_i32_2 = arith.constant 0 : i32
    return %c0_i32, %c0_i32_0, %c0_i32_1 : i32, i32, i32
  }
  func.func @transform_4(%arg0: i32) -> (i32, i32, i32) {
    %c0_i32 = arith.constant 0 : i32
    %c0_i32_0 = arith.constant 0 : i32
    %c0_i32_1 = arith.constant 0 : i32
    %c0_i32_2 = arith.constant 0 : i32
    return %c0_i32, %c0_i32_0, %c0_i32_1 : i32, i32, i32
  }
  func.func @transform_5(%arg0: i32) -> (i32, i32, i32) {
    %c0_i32 = arith.constant 0 : i32
    %c0_i32_0 = arith.constant 0 : i32
    %c0_i32_1 = arith.constant 0 : i32
    %c0_i32_2 = arith.constant 0 : i32
    return %c0_i32, %c0_i32_0, %c0_i32_1 : i32, i32, i32
  }
  func.func @transform_6(%arg0: i32) -> (i32, i32, i32) {
    %c0_i32 = arith.constant 0 : i32
    %c0_i32_0 = arith.constant 0 : i32
    %c0_i32_1 = arith.constant 0 : i32
    %c0_i32_2 = arith.constant 0 : i32
    return %c0_i32, %c0_i32_0, %c0_i32_1 : i32, i32, i32
  }
  func.func @transform_7(%arg0: i32) -> (i32, i32, i32) {
    %c0_i32 = arith.constant 0 : i32
    %c0_i32_0 = arith.constant 0 : i32
    %c0_i32_1 = arith.constant 0 : i32
    return %arg0, %c0_i32, %c0_i32_0 : i32, i32, i32
  }
}

</mosaic_0001>

<bundles_post_ra>
// kernel: vgg_forward.1
= control target key start
LH: loop header
LB: loop body
LE: loop exit
PB: predicated region body
PF: predicated region fallthrough
CT: control target
= control target key end

     0   :  { %s2784_s0 = inlined_call_operand.vmem [shape: f32[2,16,128], index: 0, kind: input, shape index: {}]   ;;  %s2785_s1 = inlined_call_operand.hbm [shape: f32[6,128,384], index: 1, kind: input, shape index: {}]   ;;  %s2786_s2 = inlined_call_operand.hbm [shape: f32[6,1,128], index: 2, kind: input, shape index: {}]   ;;  %s2787_s3 = inlined_call_operand.hbm [shape: f32[3,128,128], index: 3, kind: input, shape index: {}]   ;;  %s2788_s4 = inlined_call_operand.hbm [shape: f32[3,128,128], index: 4, kind: input, shape index: {}]   ;;  %s2789_s5 = inlined_call_operand.hbm [shape: f32[4,128,128], index: 5, kind: input, shape index: {}]   ;;  %s2790_s6 = inlined_call_operand.hbm [shape: f32[3,1,128], index: 6, kind: input, shape index: {}]   ;;  %s2791_s7 = inlined_call_operand.hbm [shape: f32[2,1,128], index: 7, kind: output, shape index: {}]  }
   0x1   :  { %2794 = sst [smem:[#allocation20_spill]] %s2785_s1 }
   0x2   :  { %2795 = sst [smem:[#allocation21_spill]] %s2786_s2 }
   0x3   :  { %2796 = sst [smem:[#allocation22_spill]] %s2787_s3 }
   0x4   :  { %2797 = sst [smem:[#allocation23_spill]] %s2788_s4 }
   0x5   :  { %12 = vsyncpa [#allocation3], 0 }
   0x6   :  { %13 = vsyncpa [#allocation6], 0 }
   0x7   :  { %14 = vsyncpa [#allocation9], 0 }
   0x8   :  { %15 = vsyncpa [#allocation12], 0 }
   0x9   :  { %16 = vsyncpa [#allocation4], 0 }
   0xa   :  { %18 = vsyncpa [#allocation4 + $0x1], 0  ;;  %s2550_s24 = smov 0   ;;  %s2552_s25 = smov 0  }
   0xb   :  { %s2554_s26 = smov 0   ;;  %s2556_s27 = smov 0  }
   0xc LB: > { %s2571_s28 = sadd.s32 4294967295, %s2495_s27   ;;  %s2069_s29 = sadd.s32 4294967294, %s2495_s27   ;;  %s2495_s27 = sphi %s2556_s27, %s2813_s27   ;;  %s2491_s26 = sphi %s2554_s26, %s2812_s26   ;;  %s2487_s25 = sphi %s2552_s25, %s2811_s25   ;;  %s2483_s24 = sphi %s2550_s24, %s2810_s24  }
   0xd   : > { %s2575_s30 = sadd.s32 1, %s2495_s27   ;;  %s183_s8 = sadd.s32 1, %s2491_s26 }
   0xe   : > { %s180_s9 = ssub.s32 %s2495_s27, %s2575_s30  ;;  %p193_p0 = scmp.ne.s32.totalorder %s2491_s26, %s2487_s25 }
   0xf   : > { %p181_p1 = scmp.eq.s32.totalorder %s180_s9, 0  ;;  %p194_p2 = scmp.eq.s32.totalorder %s2571_s28, 1 }
  0x10   : > { %p199_p3 = scmp.ne.s32.totalorder %s2487_s25, %s2483_s24  ;;  %p200_p4 = scmp.eq.s32.totalorder %s2069_s29, 1 }
  0x11   : > { %s2586_s10 = scalar_select %p181_p1, %s2491_s26, %s183_s8  }
  0x12   : > { %p2588_p5 = por %p194_p2, %p193_p0  ;;  %p2592_p6 = por %p200_p4, %p199_p3 }
  0x13   : > { %2798 = sst [smem:[#allocation19_spill]] %s2586_s10  ;;  %p2070_p7 = scmp.ge.s32.totalorder %s2495_s27, 1 }
  0x14   : > { %p207_p8 = scmp.lt.s32.totalorder %s2495_s27, 3  ;;  %p2173_p9 = scmp.eq.s32.totalorder %s2571_s28, 0 }
  0x15   : > { %s2802_s2 = sld [smem:[#allocation21_spill]]  ;;  %s2497_s17 = smov [#allocation5]  }
  0x16   : > { %p2599_p10 = pnand %p2070_p7, %p207_p8  ;;  %s234_s18 = sshll.u32 %s2497_s17, 4  ;;  %s235_s18 = int_to_ptr.vmem [resolvable:$true] %s234_s18 }
  0x17   : > { %s2804_s4 = sld [smem:[#allocation23_spill]]  ;;  %s2792_s23 = smov 16  }
  0x18   : > { %p2150_p11 = pneg %p2599_p10  ;;  %s2793_s29 = smov 1  }
  0x19   : > { %s2500_s8 = smov [#allocation8]   ;;  %s2805_s1 = sld [smem:[#allocation20_spill]] }
  0x1a   : > { %p2610_p12 = pnand %p2173_p9, %p2150_p11  ;;  %s262_s9 = sshll.u32 %s2500_s8, 4  ;;  %s263_s9 = int_to_ptr.vmem [resolvable:$true] %s262_s9 }
  0x1b   : > { %s232_s16 = sshll.u32 %s2802_s2, 4  ;;  %s2501_s20 = smov 128   ;;  %s233_s16 = int_to_ptr.hbm [resolvable:$true] %s232_s16 }
  0x1c   : > { %2156 = dma.hbm_to_vmem [thread:$0]  (!%p2610_p12), %s233_s16, 96, %s235_s18, [#allocation6], %s2792_s23, %s2792_s23, %s2793_s29  }
  0x1d   : > { %s260_s22 = sshll.u32 %s2804_s4, 4  ;;  %s2502_s21 = smov 8   ;;  %s261_s22 = int_to_ptr.hbm [resolvable:$true] %s260_s22 }
  0x1e   : > { %2162 = dma.hbm_to_vmem [thread:$0]  (!%p2610_p12), %s261_s22, 6144, %s263_s9, [#allocation9], %s2501_s20, %s2501_s20, %s2502_s21  }
  0x1f   : > { %s218_s17 = sshll.u32 %s2805_s1, 4  ;;  %s2503_s2 = smov [#allocation2]   ;;  %s219_s17 = int_to_ptr.hbm [resolvable:$true] %s218_s17 }
  0x20   : > { %s220_s4 = sshll.u32 %s2503_s2, 4  ;;  %s2806_s3 = sld [smem:[#allocation22_spill]]  ;;  %s221_s4 = int_to_ptr.vmem [resolvable:$true] %s220_s4 }
  0x21   : > { %s2504_s8 = smov 384   ;;  %s2505_s23 = smov 24  }
  0x22   : > { %2153 = dma.hbm_to_vmem [thread:$0]  (!%p2610_p12), %s219_s17, 36864, %s221_s4, [#allocation3], %s2504_s8, %s2504_s8, %s2505_s23  }
  0x23   : > { %s2506_s14 = smov [#allocation7]   ;;  %s274_s22 = sshll.u32 %s2789_s5, 4  ;;  %s275_s22 = int_to_ptr.hbm [resolvable:$true] %s274_s22 }
  0x24   : > { %s248_s15 = sshll.u32 %s2506_s14, 4  ;;  %s288_s9 = sshll.u32 %s2790_s6, 4  ;;  %s249_s15 = int_to_ptr.vmem [resolvable:$true] %s248_s15  ;;  %s289_s9 = int_to_ptr.hbm [resolvable:$true] %s288_s9 }
  0x25   : > { %s2507_s16 = smov [#allocation10]   ;;  %s2508_s4 = smov [#allocation11]  }
  0x26   : > { %s246_s18 = sshll.u32 %s2806_s3, 4  ;;  %s276_s3 = sshll.u32 %s2507_s16, 4  ;;  %s247_s18 = int_to_ptr.hbm [resolvable:$true] %s246_s18  ;;  %s277_s3 = int_to_ptr.vmem [resolvable:$true] %s276_s3 }
  0x27   : > { %2159 = dma.hbm_to_vmem [thread:$0]  (!%p2610_p12), %s247_s18, 6144, %s249_s15, [#allocation6], %s2501_s20, %s2501_s20, %s2502_s21  }
  0x28   : > { %2165 = dma.hbm_to_vmem [thread:$0]  (!%p2610_p12), %s275_s22, 8192, %s277_s3, [#allocation9], %s2501_s20, %s2501_s20, %s2502_s21  }
  0x29   : > { %s290_s23 = sshll.u32 %s2508_s4, 4  ;;  %s2807_s1 = smov 1   ;;  %s291_s23 = int_to_ptr.vmem [resolvable:$true] %s290_s23 }
  0x2a   : > { %s2808_s29 = smov 16   ;;  %314 = sbr.rel (%p2599_p10) target bundleno = 2959 (0xb8f), region = 48 }
  0x2b   : > { %2168 = dma.hbm_to_vmem [thread:$0]  (!%p2610_p12), %s289_s9, 48, %s291_s23, [#allocation12], %s2808_s29, %s2808_s29, %s2807_s1  }
  0x2f   : > { %2462 = dma.done.wait (%p2173_p9), [#allocation3], 36864  }
  0x30   : > { %2464 = vsyncadd (%p2173_p9), [#allocation3], 4294930432 }
  0x31   : > { %2466 = dma.done.wait (%p2173_p9), [#allocation6], 6240  }
  0x32   : > { %2468 = vsyncadd (%p2173_p9), [#allocation6], 4294961056 }
  0x33   : > { %2470 = dma.done.wait (%p2173_p9), [#allocation9], 14336  }
  0x34   : > { %2472 = vsyncadd (%p2173_p9), [#allocation9], 4294952960 }
  0x35   : > { %2474 = dma.done.wait (%p2173_p9), [#allocation12], 48  }
  0x36   : > { %2476 = vsyncadd (%p2173_p9), [#allocation12], 4294967248  ;;  %v423_v0 = vld [vmem:[#allocation2 + $0x168] sm:$0xff]  ;;  %v425_v1 = vld [vmem:[#allocation2 + $0x178] sm:$0xff]  ;;  %p371_p13 = scmp.lt.s32.totalorder %s2571_s28, 1  ;;  %v495_v50 = vlaneseq  ;;  %vm508_vm1 = vcmask 130048   ;;  %s1950_s14 = scalar_lea.hbm %s2791_s7, %s2571_s28 }
  0x37   : > { %v420_v2 = vld [vmem:[#allocation2 + $0x150] sm:$0xff]  ;;  %426 = vmatpush.msra.mxu0 %v423_v0  ;;  %472 = vmatpush.msra.mxu2 %v425_v1  ;;  %v422_v3 = vld [vmem:[#allocation2 + $0x160] sm:$0xff]  ;;  %v417_v4 = vld [vmem:[#allocation2 + $0x138] sm:$0xff]  ;;  %v2509_v1 = vmov 0.0   ;;  %vm997_vm7 = vcmask 64512   ;;  %vm1439_vm8 = vcmask 1043456  }
  0x38   : > { %v419_v5 = vld [vmem:[#allocation2 + $0x148] sm:$0xff]  ;;  %v414_v6 = vld [vmem:[#allocation2 + $0x120] sm:$0xff]  ;;  %v416_v7 = vld [vmem:[#allocation2 + $0x130] sm:$0xff]  ;;  %s372_s3 = scalar_select %p371_p13, %s2571_s28, 1  ;;  %v2670_v51 = vshrl.u32 %v495_v50, 7  ;;  %v2672_v53 = vand.u32 127, %v495_v50 }
  0x39   : > { %427 = vmatpush.msra.mxu0 %v420_v2  ;;  %473 = vmatpush.msra.mxu2 %v422_v3  ;;  %v411_v8 = vld [vmem:[#allocation2 + $0x108] sm:$0xff]  ;;  %v413_v9 = vld [vmem:[#allocation2 + $0x118] sm:$0xff]  ;;  %v408_v10 = vld [vmem:[#allocation2 + $0xf0] sm:$0xff]  ;;  %vm1436_vm9 = vcmask 31744   ;;  %s369_s21 = sand.u32 1, %s2487_s25   ;;  %s1954_s2 = sshll.u32 %s1950_s14, 4  ;;  %s1955_s2 = int_to_ptr.hbm [resolvable:$true] %s1954_s2 }
  0x3a   : > { %v410_v11 = vld [vmem:[#allocation2 + $0x100] sm:$0xff]  ;;  %v405_v12 = vld [vmem:[#allocation2 + $0xd8] sm:$0xff]  ;;  %v407_v13 = vld [vmem:[#allocation2 + $0xe8] sm:$0xff]  ;;  %s2123_s13 = sshll.u32 %s372_s3, 4  ;;  %v500_v54 = vadd.s32 4294967295, %v2670_v51  ;;  %v497_v60 = vadd.s32 8, %v2670_v51 }
  0x3b   : > { %428 = vmatpush.msra.mxu0 %v417_v4  ;;  %474 = vmatpush.msra.mxu2 %v419_v5  ;;  %v424_v14 = vld [vmem:[#allocation2 + $0x170] sm:$0xff]  ;;  %v421_v15 = vld [vmem:[#allocation2 + $0x158] sm:$0xff]  ;;  %v402_v16 = vld [vmem:[#allocation2 + $0xc0] sm:$0xff]  ;;  %s375_s20 = scalar_lea.vmem %s2784_s0, %s2123_s13  ;;  %s370_s15 = scalar_lea.vmem [#allocation13], %s369_s21 }
  0x3c   : > { %v404_v17 = vld [vmem:[#allocation2 + $0xd0] sm:$0xff]  ;;  %v399_v18 = vld [vmem:[#allocation2 + $0xa8] sm:$0xff]  ;;  %449 = vmatpush.msra.mxu1 %v424_v14  ;;  %v401_v19 = vld [vmem:[#allocation2 + $0xb8] sm:$0xff]  ;;  %vm502_vm0 = vcmp.eq.s32.totalorder %v2672_v53, %v500_v54  ;;  %v501_v4 = vadd.s32 4294967295, %v497_v60  ;;  %s1952_s22 = sshll.u32 %s370_s15, 4  ;;  %s1942_s10 = scalar_lea.sflag [#allocation4], %s369_s21  ;;  %s1953_s22 = int_to_ptr.vmem [resolvable:$true] %s1952_s22 }
  0x3d   : > { %429 = vmatpush.msra.mxu0 %v414_v6  ;;  %475 = vmatpush.msra.mxu2 %v416_v7  ;;  %v418_v20 = vld [vmem:[#allocation2 + $0x140] sm:$0xff]  ;;  %v415_v21 = vld [vmem:[#allocation2 + $0x128] sm:$0xff]  ;;  %v396_v22 = vld [vmem:[#allocation2 + $0x90] sm:$0xff]  ;;  %v2678_v2 = vsel %vm502_vm0, 1.0, %v2509_v1  ;;  %s2431_s9 = sshra.s32 %s1955_s2, 4  ;;  %s2437_s28 = scalar_lea.hbm %s2791_s7, 2  ;;  %s2432_s9 = int_to_ptr.hbm [resolvable:$true] %s2431_s9 }
  0x3e   : > { %450 = vmatpush.msra.mxu1 %v421_v15  ;;  %v398_v23 = vld [vmem:[#allocation2 + $0xa0] sm:$0xff]  ;;  %v412_v24 = vld [vmem:[#allocation2 + $0x110] sm:$0xff]  ;;  %v393_v25 = vld [vmem:[#allocation2 + $0x78] sm:$0xff]  ;;  %vm503_vm2 = vcmp.eq.s32.totalorder %v2672_v53, %v501_v4  ;;  %s2433_s16 = scalar_lea.hbm %s2432_s9, 1  ;;  %p2438_p3 = scmp.lt.s32.totalorder %s2432_s9, %s2791_s7 }
  0x3f   : > { %430 = vmatpush.msra.mxu0 %v411_v8  ;;  %476 = vmatpush.msra.mxu2 %v413_v9  ;;  %v395_v26 = vld [vmem:[#allocation2 + $0x88] sm:$0xff]  ;;  %v409_v27 = vld [vmem:[#allocation2 + $0xf8] sm:$0xff]  ;;  %v390_v28 = vld [vmem:[#allocation2 + $0x60] sm:$0xff]  ;;  %v2684_v7 = vsel %vm503_vm2, 1.0, %v2509_v1  ;;  %v538_v8 = vadd.s32 1, %v2670_v51  ;;  %p2434_p0 = scmp.ne.s32.totalorder %s2432_s9, %s2433_s16  ;;  %p2439_p4 = scmp.lt.s32.totalorder %s2437_s28, %s2433_s16 }
  0x40   : > { %451 = vmatpush.msra.mxu1 %v418_v20  ;;  %v392_v29 = vld [vmem:[#allocation2 + $0x70] sm:$0xff]  ;;  %v406_v30 = vld [vmem:[#allocation2 + $0xe0] sm:$0xff]  ;;  %v387_v31 = vld [vmem:[#allocation2 + $0x48] sm:$0xff] }
  0x41   : > { %431 = vmatpush.msra.mxu0 %v408_v10  ;;  %477 = vmatpush.msra.mxu2 %v410_v11  ;;  %v389_v32 = vld [vmem:[#allocation2 + $0x58] sm:$0xff]  ;;  %v384_v33 = vld [vmem:[#allocation2 + $0x30] sm:$0xff]  ;;  %v386_v34 = vld [vmem:[#allocation2 + $0x40] sm:$0xff]  ;;  %vm540_vm3 = vcmp.eq.s32.totalorder %v2672_v53, %v538_v8  ;;  %p2435_p1 = pnand %p2434_p0, %p2588_p5  ;;  %p2440_p7 = por %p2439_p4, %p2438_p3 }
  0x42   : > { %452 = vmatpush.msra.mxu1 %v415_v21  ;;  %v381_v35 = vld [vmem:[#allocation2 + $0x18] sm:$0xff]  ;;  %v383_v36 = vld [vmem:[#allocation2 + $0x28] sm:$0xff]  ;;  %v378_v37 = vld [vmem:[#allocation2] sm:$0xff] }
  0x43   : > { %432 = vmatpush.msra.mxu0 %v405_v12  ;;  %478 = vmatpush.msra.mxu2 %v407_v13  ;;  %v380_v38 = vld [vmem:[#allocation2 + $0x10] sm:$0xff]  ;;  %v376_v39 = vld [vmem:[%s375_s20] sm:$0xff]  ;;  %v377_v40 = vld [vmem:[%s375_s20 + $0x8] sm:$0xff]  ;;  %v2691_v12 = vsel %vm540_vm3, 1.0, %v2509_v1  ;;  %v539_v13 = vadd.s32 1, %v497_v60  ;;  %p2436_p2 = pneg %p2435_p1 }
  0x44   : > { %453 = vmatpush.msra.mxu1 %v412_v24  ;;  %v403_v41 = vld [vmem:[#allocation2 + $0xc8] sm:$0xff]  ;;  %v400_v42 = vld [vmem:[#allocation2 + $0xb0] sm:$0xff]  ;;  %v397_v43 = vld [vmem:[#allocation2 + $0x98] sm:$0xff] }
  0x45   : > { %433 = vmatpush.msra.mxu0 %v402_v16  ;;  %479 = vmatpush.msra.mxu2 %v404_v17  ;;  %v394_v44 = vld [vmem:[#allocation2 + $0x80] sm:$0xff]  ;;  %v391_v45 = vld [vmem:[#allocation2 + $0x68] sm:$0xff]  ;;  %v388_v46 = vld [vmem:[#allocation2 + $0x50] sm:$0xff]  ;;  %vm541_vm4 = vcmp.eq.s32.totalorder %v2672_v53, %v539_v13  ;;  %p2441_p8 = pnand %p2440_p7, %p2436_p2 }
  0x46   : > { %454 = vmatpush.msra.mxu1 %v409_v27  ;;  %v385_v47 = vld [vmem:[#allocation2 + $0x38] sm:$0xff]  ;;  %v382_v48 = vld [vmem:[#allocation2 + $0x20] sm:$0xff]  ;;  %v379_v49 = vld [vmem:[#allocation2 + $0x8] sm:$0xff]  ;;  %v2697_v14 = vsel %vm541_vm4, 1.0, %v2509_v1 }
  0x47   : > { %434 = vmatpush.msra.mxu0 %v399_v18  ;;  %480 = vmatpush.msra.mxu2 %v401_v19  ;;  %v632_v55 = vld [vmem:[#allocation2 + $0x2f0] sm:$0xff]  ;;  %v633_v56 = vld [vmem:[#allocation2 + $0x2f8] sm:$0xff]  ;;  %v630_v58 = vld [vmem:[#allocation2 + $0x2e0] sm:$0xff] }
  0x48   : > { %455 = vmatpush.msra.mxu1 %v406_v30  ;;  %v629_v57 = vld [vmem:[#allocation2 + $0x2d8] sm:$0xff]  ;;  %v626_v61 = vld [vmem:[#allocation2 + $0x2c0] sm:$0xff]  ;;  %v627_v62 = vld [vmem:[#allocation2 + $0x2c8] sm:$0xff] }
  0x49   : > { %435 = vmatpush.msra.mxu0 %v396_v22  ;;  %481 = vmatpush.msra.mxu2 %v398_v23  ;;  %v623_v0 = vld [vmem:[#allocation2 + $0x2a8] sm:$0xff]  ;;  %v624_v3 = vld [vmem:[#allocation2 + $0x2b0] sm:$0xff]  ;;  %v625_v10 = vld [vmem:[#allocation2 + $0x2b8] sm:$0xff] }
  0x4a   : > { %456 = vmatpush.msra.mxu1 %v403_v41  ;;  %v631_v6 = vld [vmem:[#allocation2 + $0x2e8] sm:$0xff]  ;;  %v628_v9 = vld [vmem:[#allocation2 + $0x2d0] sm:$0xff]  ;;  %v622_v11 = vld [vmem:[#allocation2 + $0x2a0] sm:$0xff] }
  0x4b   : > { %436 = vmatpush.msra.mxu0 %v393_v25  ;;  %482 = vmatpush.msra.mxu2 %v395_v26  ;;  %v619_v15 = vld [vmem:[#allocation2 + $0x288] sm:$0xff]  ;;  %v620_v16 = vld [vmem:[#allocation2 + $0x290] sm:$0xff]  ;;  %v621_v17 = vld [vmem:[#allocation2 + $0x298] sm:$0xff] }
  0x4c   : > { %457 = vmatpush.msra.mxu1 %v400_v42  ;;  %v616_v18 = vld [vmem:[#allocation2 + $0x270] sm:$0xff]  ;;  %v617_v19 = vld [vmem:[#allocation2 + $0x278] sm:$0xff]  ;;  %v618_v20 = vld [vmem:[#allocation2 + $0x280] sm:$0xff] }
  0x4d   : > { %437 = vmatpush.msra.mxu0 %v390_v28  ;;  %483 = vmatpush.msra.mxu2 %v392_v29  ;;  %v613_v21 = vld [vmem:[#allocation2 + $0x258] sm:$0xff]  ;;  %v614_v22 = vld [vmem:[#allocation2 + $0x260] sm:$0xff]  ;;  %v615_v23 = vld [vmem:[#allocation2 + $0x268] sm:$0xff] }
  0x4e   : > { %458 = vmatpush.msra.mxu1 %v397_v43  ;;  %v610_v24 = vld [vmem:[#allocation2 + $0x240] sm:$0xff]  ;;  %v611_v25 = vld [vmem:[#allocation2 + $0x248] sm:$0xff]  ;;  %v612_v26 = vld [vmem:[#allocation2 + $0x250] sm:$0xff] }
  0x4f   : > { %438 = vmatpush.msra.mxu0 %v387_v31  ;;  %484 = vmatpush.msra.mxu2 %v389_v32  ;;  %v607_v27 = vld [vmem:[#allocation2 + $0x228] sm:$0xff]  ;;  %v608_v28 = vld [vmem:[#allocation2 + $0x230] sm:$0xff]  ;;  %v609_v29 = vld [vmem:[#allocation2 + $0x238] sm:$0xff] }
  0x50   : > { %459 = vmatpush.msra.mxu1 %v394_v44  ;;  %v604_v30 = vld [vmem:[#allocation2 + $0x210] sm:$0xff]  ;;  %v605_v31 = vld [vmem:[#allocation2 + $0x218] sm:$0xff]  ;;  %v606_v32 = vld [vmem:[#allocation2 + $0x220] sm:$0xff] }
  0x51   : > { %439 = vmatpush.msra.mxu0 %v384_v33  ;;  %485 = vmatpush.msra.mxu2 %v386_v34  ;;  %v601_v33 = vld [vmem:[#allocation2 + $0x1f8] sm:$0xff]  ;;  %v602_v34 = vld [vmem:[#allocation2 + $0x200] sm:$0xff]  ;;  %v592_v42 = vld [vmem:[#allocation2 + $0x1b0] sm:$0xff] }
  0x52   : > { %460 = vmatpush.msra.mxu1 %v391_v45  ;;  %v597_v41 = vld [vmem:[#allocation2 + $0x1d8] sm:$0xff]  ;;  %v594_v44 = vld [vmem:[#allocation2 + $0x1c0] sm:$0xff]  ;;  %v588_v50 = vld [vmem:[#allocation2 + $0x190] sm:$0xff] }
  0x53   : > { %440 = vmatpush.msra.mxu0 %v381_v35  ;;  %486 = vmatpush.msra.mxu2 %v383_v36  ;;  %v603_v35 = vld [vmem:[#allocation2 + $0x208] sm:$0xff]  ;;  %v598_v36 = vld [vmem:[#allocation2 + $0x1e0] sm:$0xff]  ;;  %v593_v43 = vld [vmem:[#allocation2 + $0x1b8] sm:$0xff] }
  0x54   : > { %461 = vmatpush.msra.mxu1 %v388_v46  ;;  %v589_v45 = vld [vmem:[#allocation2 + $0x198] sm:$0xff]  ;;  %v590_v46 = vld [vmem:[#allocation2 + $0x1a0] sm:$0xff] }
  0x55   : > { %441 = vmatpush.msra.mxu0 %v378_v37  ;;  %487 = vmatpush.msra.mxu2 %v380_v38  ;;  %v599_v37 = vld [vmem:[#allocation2 + $0x1e8] sm:$0xff]  ;;  %v600_v38 = vld [vmem:[#allocation2 + $0x1f0] sm:$0xff] }
  0x56   : > { %442 = vmatmul.f32.vlgmr.msra.gmra.mxu0 %v376_v39  ;;  %488 = vmatmul.f32.vlgmr.msra.gmra.mxu2 %v376_v39 }
  0x57   : > { %462 = vmatpush.msra.mxu1 %v385_v47  ;;  %657 = vmatpush.msrb.mxu0 %v632_v55  ;;  %v591_v47 = vld [vmem:[#allocation2 + $0x1a8] sm:$0xff] }
  0x59   : > { %463 = vmatpush.msra.mxu1 %v382_v48  ;;  %658 = vmatpush.msrb.mxu0 %v629_v57  ;;  %v586_v48 = vld [vmem:[#allocation2 + $0x180] sm:$0xff] }
  0x5a   : > { %v2231_v57 = vld [vmem:[#allocation5] ss:$0 sm:$0xff] }
  0x5b   : > { %464 = vmatpush.msra.mxu1 %v379_v49  ;;  %659 = vmatpush.msrb.mxu0 %v626_v61  ;;  %v587_v49 = vld [vmem:[#allocation2 + $0x188] sm:$0xff] }
  0x5c   : > { %465 = vmatmul.f32.vlgmr.msra.gmra.mxu1 %v376_v39  ;;  %v595_v39 = vld [vmem:[#allocation2 + $0x1c8] sm:$0xff] }
  0x5d   : > { %680 = vmatpush.msrb.mxu1 %v633_v56  ;;  %660 = vmatpush.msrb.mxu0 %v623_v0 }
  0x5e   : > { %445 = vmatmul.f32.gmra.mxu0 %v377_v40  ;;  %491 = vmatmul.f32.gmra.mxu2 %v377_v40 }
  0x5f   : > { %681 = vmatpush.msrb.mxu1 %v630_v58  ;;  %661 = vmatpush.msrb.mxu0 %v620_v16  ;;  %v866_v16 = vld [vmem:[#allocation8 + $0x78] sm:$0xff] }
  0x61   : > { %682 = vmatpush.msrb.mxu1 %v627_v62  ;;  %662 = vmatpush.msrb.mxu0 %v617_v19  ;;  %v828_v19 = vld [vmem:[#allocation7 + $0x68] sm:$0xff] }
  0x63   : > { %683 = vmatpush.msrb.mxu1 %v624_v3  ;;  %663 = vmatpush.msrb.mxu0 %v614_v22  ;;  %v827_v22 = vld [vmem:[#allocation7 + $0x60] sm:$0xff] }
  0x64   : > { %468 = vmatmul.f32.gmra.mxu1 %v377_v40  ;;  %v596_v40 = vld [vmem:[#allocation2 + $0x1d0] sm:$0xff] }
  0x65   : > { %684 = vmatpush.msrb.mxu1 %v621_v17  ;;  %664 = vmatpush.msrb.mxu0 %v611_v25  ;;  %v829_v17 = vld [vmem:[#allocation7 + $0x70] sm:$0xff] }
  0x66   : > { %v825_v25 = vld [vmem:[#allocation7 + $0x50] sm:$0xff] }
  0x67   : > { %685 = vmatpush.msrb.mxu1 %v618_v20  ;;  %665 = vmatpush.msrb.mxu0 %v608_v28  ;;  %v864_v20 = vld [vmem:[#allocation8 + $0x68] sm:$0xff] }
  0x68   : > { %v824_v28 = vld [vmem:[#allocation7 + $0x48] sm:$0xff] }
  0x69   : > { %686 = vmatpush.msrb.mxu1 %v615_v23  ;;  %666 = vmatpush.msrb.mxu0 %v605_v31  ;;  %v863_v23 = vld [vmem:[#allocation8 + $0x60] sm:$0xff] }
  0x6a   : > { %v823_v31 = vld [vmem:[#allocation7 + $0x40] sm:$0xff] }
  0x6b   : > { %687 = vmatpush.msrb.mxu1 %v612_v26  ;;  %667 = vmatpush.msrb.mxu0 %v602_v34  ;;  %v861_v26 = vld [vmem:[#allocation8 + $0x50] sm:$0xff]  ;;  %v2232_v34 = vld [vmem:[#allocation5 + $0x1] ss:$0 sm:$0xff] }
  0x6d   : > { %688 = vmatpush.msrb.mxu1 %v609_v29  ;;  %668 = vmatpush.msrb.mxu0 %v599_v37  ;;  %v860_v29 = vld [vmem:[#allocation8 + $0x48] sm:$0xff]  ;;  %v760_v37 = vmul.u32 2, %v2670_v51 }
  0x6f   : > { %689 = vmatpush.msrb.mxu1 %v606_v32  ;;  %669 = vmatpush.msrb.mxu0 %v596_v40  ;;  %v859_v32 = vld [vmem:[#allocation8 + $0x40] sm:$0xff]  ;;  %vm761_vm5 = vcmp.eq.s32.totalorder %v2672_v53, %v760_v37 }
  0x70   : > { %v2712_v51 = vsel %vm761_vm5, 1.0, %v2509_v1 }
  0x71   : > { %690 = vmatpush.msrb.mxu1 %v603_v35  ;;  %670 = vmatpush.msrb.mxu0 %v593_v43 }
  0x73   : > { %691 = vmatpush.msrb.mxu1 %v600_v38  ;;  %671 = vmatpush.msrb.mxu0 %v590_v46  ;;  %v822_v38 = vld [vmem:[#allocation7 + $0x38] sm:$0xff] }
  0x75   : > { %692 = vmatpush.msrb.mxu1 %v597_v41  ;;  %672 = vmatpush.msrb.mxu0 %v587_v49  ;;  %v821_v41 = vld [vmem:[#allocation7 + $0x30] sm:$0xff]  ;;  %v820_v49 = vld [vmem:[#allocation7 + $0x28] sm:$0xff] }
  0x77   : > { %693 = vmatpush.msrb.mxu1 %v594_v44 }
  0x79   : > { %694 = vmatpush.msrb.mxu1 %v591_v47  ;;  %v787_v47 = vadd.s32 1, %v760_v37  ;;  %v898_v37 = vld [vmem:[#allocation2 + $0x348] sm:$0xff] }
  0x7b   : > { %695 = vmatpush.msrb.mxu1 %v588_v50  ;;  %vm788_vm6 = vcmp.eq.s32.totalorder %v2672_v53, %v787_v47  ;;  %v856_v50 = vld [vmem:[#allocation8 + $0x28] sm:$0xff] }
  0x7c   : > { %v816_v53 = vld [vmem:[#allocation7 + $0x8] sm:$0xff] }
  0x7d   : > { %867 = vmatpush.msra.mxu1 %v866_v16  ;;  %v924_v16 = vld [vmem:[#allocation2 + $0x418] sm:$0xff]  ;;  %v894_v47 = vld [vmem:[#allocation2 + $0x328] sm:$0xff] }
  0xd3   : > { %v443_v52 = vpop.f32.mrf.mxu0 }
  0xd9   : > { %v489_v59 = vpop.f32.mrf.mxu2  ;;  %v466_v55 = vpop.f32.mrf.mxu1 }
  0xdb   : > { %v446_v63 = vpop.f32.mrf.mxu0 }
  0xdc   : > { %529 = vmatpush.msra.mxu3 %v446_v63 }
  0xde   : > { %530 = vmatpush.msra.mxu3 %v443_v52 }
  0xdf   : > { %2089 = vmatmul.msk.f32.vlgmr.msra.gmra.mxu3 %vm508_vm1, %v2678_v2 }
  0xe1   : > { %v492_v5 = vpop.f32.mrf.mxu2  ;;  %v469_v61 = vpop.f32.mrf.mxu1 }
  0xe2   : > { %566 = vmatpush.msrb.mxu3 %v492_v5 }
  0xe4   : > { %567 = vmatpush.msrb.mxu3 %v489_v59 }
  0xe6   : > { %634 = vmatpush.msra.mxu3 %v631_v6 }
  0xe7   : > { %2090 = vmatmul.msk.f32.gmra.mxu3 %vm508_vm1, %v2684_v7 }
  0xe8   : > { %635 = vmatpush.msra.mxu3 %v628_v9 }
  0xea   : > { %636 = vmatpush.msra.mxu3 %v625_v10 }
  0xec   : > { %637 = vmatpush.msra.mxu3 %v622_v11 }
  0xee   : > { %638 = vmatpush.msra.mxu3 %v619_v15  ;;  %v830_v15 = vld [vmem:[#allocation7 + $0x78] sm:$0xff] }
  0xef   : > { %2093 = vmatmul.msk.f32.vlgmr.msrb.gmra.mxu3 %vm508_vm1, %v2691_v12 }
  0xf0   : > { %639 = vmatpush.msra.mxu3 %v616_v18  ;;  %v865_v18 = vld [vmem:[#allocation8 + $0x70] sm:$0xff] }
  0xf1   : > { %868 = vmatpush.msra.mxu1 %v865_v18  ;;  %v920_v18 = vld [vmem:[#allocation2 + $0x3f8] sm:$0xff] }
  0xf2   : > { %640 = vmatpush.msra.mxu3 %v613_v21 }
  0xf3   : > { %869 = vmatpush.msra.mxu1 %v864_v20  ;;  %v916_v20 = vld [vmem:[#allocation2 + $0x3d8] sm:$0xff] }
  0xf4   : > { %641 = vmatpush.msra.mxu3 %v610_v24 }
  0xf5   : > { %870 = vmatpush.msra.mxu1 %v863_v23  ;;  %v913_v23 = vld [vmem:[#allocation2 + $0x3c0] sm:$0xff] }
  0xf6   : > { %642 = vmatpush.msra.mxu3 %v607_v27 }
  0xf7   : > { %2094 = vmatmul.msk.f32.gmra.mxu3 %vm508_vm1, %v2697_v14 }
  0xf8   : > { %643 = vmatpush.msra.mxu3 %v604_v30 }
  0xfa   : > { %644 = vmatpush.msra.mxu3 %v601_v33 }
  0xfc   : > { %645 = vmatpush.msra.mxu3 %v598_v36 }
  0xfe   : > { %646 = vmatpush.msra.mxu3 %v595_v39  ;;  %v858_v39 = vld [vmem:[#allocation8 + $0x38] sm:$0xff] }
 0x100   : > { %647 = vmatpush.msra.mxu3 %v592_v42  ;;  %v857_v42 = vld [vmem:[#allocation8 + $0x30] sm:$0xff] }
 0x102   : > { %648 = vmatpush.msra.mxu3 %v589_v45 }
 0x104   : > { %649 = vmatpush.msra.mxu3 %v586_v48  ;;  %v2718_v48 = vsel %vm788_vm6, 1.0, %v2509_v1  ;;  %v852_v1 = vld [vmem:[#allocation8 + $0x8] sm:$0xff] }
 0x162   : > { %v532_v52 = vpop.f32.mrf.mxu3 }
 0x163   : > { %v533_v56 = vadd.f32 %v532_v52, %v466_v55  ;;  %v819_v52 = vld [vmem:[#allocation7 + $0x20] sm:$0xff]  ;;  %v818_v55 = vld [vmem:[#allocation7 + $0x18] sm:$0xff] }
 0x16a   : > { %v535_v54 = vpop.f32.mrf.mxu3 }
 0x16b   : > { %v536_v63 = vadd.f32 %v535_v54, %v469_v61  ;;  %v855_v54 = vld [vmem:[#allocation8 + $0x20] sm:$0xff] }
 0x16c   : > { %v934_v61 = vld [vmem:[#allocation2 + $0x468] sm:$0xff] }
 0x172   : > { %v569_v58 = vpop.f32.mrf.mxu3 }
 0x173   : > { %v575_v59 = vadd.f32 %v569_v58, %v533_v56  ;;  %v854_v56 = vld [vmem:[#allocation8 + $0x18] sm:$0xff]  ;;  %v853_v58 = vld [vmem:[#allocation8 + $0x10] sm:$0xff] }
 0x175   : > { %v581_v60 = vadd.f32 %v2231_v57, %v575_v59  ;;  %v815_v59 = vld [vmem:[#allocation7] sm:$0xff] }
 0x177   : > { %v583_v62 = vmax.f32 %v581_v60, 0.0  ;;  %v851_v60 = vld [vmem:[#allocation8] sm:$0xff] }
 0x179   : > { %650 = vmatmul.f32.vlgmr.msra.gmra.mxu3 %v583_v62  ;;  %673 = vmatmul.f32.vlgmr.msrb.gmra.mxu0 %v583_v62 }
 0x17a   : > { %696 = vmatmul.f32.vlgmr.msrb.gmra.mxu1 %v583_v62  ;;  %v572_v0 = vpop.f32.mrf.mxu3  ;;  %v935_v62 = vld [vmem:[#allocation2 + $0x470] sm:$0xff] }
 0x17b   : > { %v576_v3 = vadd.f32 %v572_v0, %v536_v63  ;;  %v936_v63 = vld [vmem:[#allocation2 + $0x478] sm:$0xff]  ;;  %v931_v0 = vld [vmem:[#allocation2 + $0x450] sm:$0xff] }
 0x17d   : > { %v582_v4 = vadd.f32 %v2231_v57, %v576_v3  ;;  %v817_v57 = vld [vmem:[#allocation7 + $0x10] sm:$0xff] }
 0x17e   : > { %v932_v3 = vld [vmem:[#allocation2 + $0x458] sm:$0xff] }
 0x17f   : > { %v584_v5 = vmax.f32 %v582_v4, 0.0  ;;  %v933_v4 = vld [vmem:[#allocation2 + $0x460] sm:$0xff] }
 0x181   : > { %653 = vmatmul.f32.gmra.mxu3 %v584_v5  ;;  %676 = vmatmul.f32.gmra.mxu0 %v584_v5 }
 0x182   : > { %699 = vmatmul.f32.gmra.mxu1 %v584_v5  ;;  %v928_v5 = vld [vmem:[#allocation2 + $0x438] sm:$0xff] }
 0x1f6   : > { %v674_v11 = vpop.f32.mrf.mxu0 }
 0x1f7   : > { %v697_v6 = vpop.f32.mrf.mxu1 }
 0x1fc   : > { %v651_v8 = vpop.f32.mrf.mxu3 }
 0x1fe   : > { %v677_v13 = vpop.f32.mrf.mxu0 }
 0x1ff   : > { %v700_v9 = vpop.f32.mrf.mxu1 }
 0x200   : > { %740 = vmatpush.msrb.mxu2 %v700_v9  ;;  %v925_v9 = vld [vmem:[#allocation2 + $0x420] sm:$0xff] }
 0x202   : > { %741 = vmatpush.msrb.mxu2 %v697_v6  ;;  %v929_v6 = vld [vmem:[#allocation2 + $0x440] sm:$0xff] }
 0x203   : > { %2097 = vmatmul.msk.f32.vlgmr.msrb.gmra.mxu2 %vm508_vm1, %v2691_v12 }
 0x204   : > { %v654_v10 = vpop.f32.mrf.mxu3  ;;  %937 = vmatpush.msra.mxu2 %v934_v61  ;;  %v1078_v61 = vld [vmem:[#allocation2 + $0x558] sm:$0xff] }
 0x205   : > { %717 = vmatpush.msra.mxu0 %v654_v10  ;;  %v926_v10 = vld [vmem:[#allocation2 + $0x428] sm:$0xff] }
 0x206   : > { %938 = vmatpush.msra.mxu2 %v931_v0  ;;  %v1069_v0 = vld [vmem:[#allocation2 + $0x510] sm:$0xff] }
 0x207   : > { %718 = vmatpush.msra.mxu0 %v651_v8  ;;  %v930_v8 = vld [vmem:[#allocation2 + $0x448] sm:$0xff] }
 0x208   : > { %2095 = vmatmul.msk.f32.vlgmr.msra.gmra.mxu0 %vm508_vm1, %v2678_v2  ;;  %939 = vmatpush.msra.mxu2 %v928_v5  ;;  %v1097_v5 = vld [vmem:[#allocation2 + $0x5f0] sm:$0xff] }
 0x209   : > { %831 = vmatpush.msrb.mxu0 %v830_v15  ;;  %v923_v15 = vld [vmem:[#allocation2 + $0x410] sm:$0xff] }
 0x20a   : > { %940 = vmatpush.msra.mxu2 %v925_v9 }
 0x20b   : > { %2098 = vmatmul.msk.f32.gmra.mxu2 %vm508_vm1, %v2697_v14  ;;  %832 = vmatpush.msrb.mxu0 %v829_v17  ;;  %v826_v14 = vld [vmem:[#allocation7 + $0x58] sm:$0xff]  ;;  %v919_v17 = vld [vmem:[#allocation2 + $0x3f0] sm:$0xff] }
 0x20d   : > { %833 = vmatpush.msrb.mxu0 %v828_v19  ;;  %v921_v19 = vld [vmem:[#allocation2 + $0x400] sm:$0xff] }
 0x20f   : > { %834 = vmatpush.msrb.mxu0 %v827_v22  ;;  %v918_v22 = vld [vmem:[#allocation2 + $0x3e8] sm:$0xff] }
 0x210   : > { %2096 = vmatmul.msk.f32.gmra.mxu0 %vm508_vm1, %v2684_v7  ;;  %v862_v7 = vld [vmem:[#allocation8 + $0x58] sm:$0xff] }
 0x211   : > { %835 = vmatpush.msrb.mxu0 %v826_v14  ;;  %871 = vmatpush.msra.mxu1 %v862_v7  ;;  %v915_v14 = vld [vmem:[#allocation2 + $0x3d0] sm:$0xff]  ;;  %v910_v7 = vld [vmem:[#allocation2 + $0x3a8] sm:$0xff] }
 0x213   : > { %836 = vmatpush.msrb.mxu0 %v825_v25  ;;  %872 = vmatpush.msra.mxu1 %v861_v26  ;;  %v911_v25 = vld [vmem:[#allocation2 + $0x3b0] sm:$0xff]  ;;  %v912_v26 = vld [vmem:[#allocation2 + $0x3b8] sm:$0xff] }
 0x215   : > { %837 = vmatpush.msrb.mxu0 %v824_v28  ;;  %873 = vmatpush.msra.mxu1 %v860_v29  ;;  %v908_v28 = vld [vmem:[#allocation2 + $0x398] sm:$0xff]  ;;  %v909_v29 = vld [vmem:[#allocation2 + $0x3a0] sm:$0xff] }
 0x217   : > { %838 = vmatpush.msrb.mxu0 %v823_v31  ;;  %874 = vmatpush.msra.mxu1 %v859_v32  ;;  %v905_v31 = vld [vmem:[#allocation2 + $0x380] sm:$0xff]  ;;  %v906_v32 = vld [vmem:[#allocation2 + $0x388] sm:$0xff] }
 0x219   : > { %839 = vmatpush.msrb.mxu0 %v822_v38  ;;  %875 = vmatpush.msra.mxu1 %v858_v39  ;;  %v899_v38 = vld [vmem:[#allocation2 + $0x350] sm:$0xff]  ;;  %v900_v39 = vld [vmem:[#allocation2 + $0x358] sm:$0xff] }
 0x21b   : > { %840 = vmatpush.msrb.mxu0 %v821_v41  ;;  %876 = vmatpush.msra.mxu1 %v857_v42  ;;  %v896_v41 = vld [vmem:[#allocation2 + $0x338] sm:$0xff]  ;;  %v897_v42 = vld [vmem:[#allocation2 + $0x340] sm:$0xff] }
 0x21d   : > { %841 = vmatpush.msrb.mxu0 %v820_v49  ;;  %877 = vmatpush.msra.mxu1 %v856_v50  ;;  %v889_v49 = vld [vmem:[#allocation2 + $0x300] sm:$0xff]  ;;  %v890_v50 = vld [vmem:[#allocation2 + $0x308] sm:$0xff] }
 0x21f   : > { %842 = vmatpush.msrb.mxu0 %v819_v52  ;;  %878 = vmatpush.msra.mxu1 %v855_v54  ;;  %v891_v52 = vld [vmem:[#allocation2 + $0x310] sm:$0xff] }
 0x221   : > { %843 = vmatpush.msrb.mxu0 %v818_v55  ;;  %879 = vmatpush.msra.mxu1 %v854_v56 }
 0x223   : > { %844 = vmatpush.msrb.mxu0 %v817_v57  ;;  %880 = vmatpush.msra.mxu1 %v853_v58  ;;  %v1096_v57 = vld [vmem:[#allocation2 + $0x5e8] sm:$0xff]  ;;  %v1093_v58 = vld [vmem:[#allocation2 + $0x5d0] sm:$0xff] }
 0x225   : > { %845 = vmatpush.msrb.mxu0 %v816_v53  ;;  %881 = vmatpush.msra.mxu1 %v852_v1  ;;  %v1090_v53 = vld [vmem:[#allocation2 + $0x5b8] sm:$0xff]  ;;  %v1087_v1 = vld [vmem:[#allocation2 + $0x5a0] sm:$0xff] }
 0x227   : > { %846 = vmatpush.msrb.mxu0 %v815_v59  ;;  %882 = vmatpush.msra.mxu1 %v851_v60  ;;  %v1084_v59 = vld [vmem:[#allocation2 + $0x588] sm:$0xff]  ;;  %v1081_v60 = vld [vmem:[#allocation2 + $0x570] sm:$0xff] }
 0x229   : > { %977 = vmatpush.msra.mxu0 %v936_v63  ;;  %1099 = vmatpush.msrb.mxu1 %v1096_v57  ;;  %v1072_v63 = vld [vmem:[#allocation2 + $0x528] sm:$0xff]  ;;  %v1268_v57 = vld [vmem:[#allocation7 + $0xf8] sm:$0xff] }
 0x22b   : > { %978 = vmatpush.msra.mxu0 %v933_v4  ;;  %1100 = vmatpush.msrb.mxu1 %v1093_v58  ;;  %v1267_v58 = vld [vmem:[#allocation7 + $0xf0] sm:$0xff] }
 0x22d   : > { %979 = vmatpush.msra.mxu0 %v930_v8  ;;  %1101 = vmatpush.msrb.mxu1 %v1090_v53  ;;  %v1091_v8 = vld [vmem:[#allocation2 + $0x5c0] sm:$0xff] }
 0x22e   : > { %v1305_v53 = vld [vmem:[#allocation8 + $0xf8] sm:$0xff] }
 0x22f   : > { %1102 = vmatpush.msrb.mxu1 %v1087_v1  ;;  %v1266_v1 = vld [vmem:[#allocation7 + $0xe8] sm:$0xff] }
 0x231   : > { %1103 = vmatpush.msrb.mxu1 %v1084_v59  ;;  %v1304_v59 = vld [vmem:[#allocation8 + $0xf0] sm:$0xff] }
 0x233   : > { %1104 = vmatpush.msrb.mxu1 %v1081_v60  ;;  %v1303_v60 = vld [vmem:[#allocation8 + $0xe8] sm:$0xff] }
 0x235   : > { %1105 = vmatpush.msrb.mxu1 %v1078_v61  ;;  %v1265_v61 = vld [vmem:[#allocation7 + $0xe0] sm:$0xff] }
 0x285   : > { %v720_v21 = vpop.f32.mrf.mxu0 }
 0x286   : > { %v743_v24 = vpop.f32.mrf.mxu2  ;;  %v721_v27 = vadd.f32 %v720_v21, %v674_v11  ;;  %v927_v11 = vld [vmem:[#allocation2 + $0x430] sm:$0xff]  ;;  %v917_v21 = vld [vmem:[#allocation2 + $0x3e0] sm:$0xff] }
 0x287   : > { %980 = vmatpush.msra.mxu0 %v927_v11  ;;  %v1088_v11 = vld [vmem:[#allocation2 + $0x5a8] sm:$0xff] }
 0x288   : > { %v749_v33 = vadd.f32 %v743_v24, %v721_v27  ;;  %v914_v24 = vld [vmem:[#allocation2 + $0x3c8] sm:$0xff]  ;;  %v907_v27 = vld [vmem:[#allocation2 + $0x390] sm:$0xff] }
 0x289   : > { %981 = vmatpush.msra.mxu0 %v924_v16  ;;  %v1092_v16 = vld [vmem:[#allocation2 + $0x5c8] sm:$0xff] }
 0x28a   : > { %v756_v43 = vadd.f32 %v2232_v34, %v749_v33  ;;  %v901_v33 = vld [vmem:[#allocation2 + $0x360] sm:$0xff] }
 0x28b   : > { %982 = vmatpush.msra.mxu0 %v921_v19  ;;  %v1079_v19 = vld [vmem:[#allocation2 + $0x560] sm:$0xff] }
 0x28c   : > { %v758_v46 = vmax.f32 %v756_v43, 0.0 }
 0x28d   : > { %v723_v30 = vpop.f32.mrf.mxu0  ;;  %983 = vmatpush.msra.mxu0 %v918_v22  ;;  %v1083_v22 = vld [vmem:[#allocation2 + $0x580] sm:$0xff] }
 0x28e   : > { %v724_v35 = vadd.f32 %v723_v30, %v677_v13  ;;  %v746_v36 = vpop.f32.mrf.mxu2  ;;  %v922_v13 = vld [vmem:[#allocation2 + $0x408] sm:$0xff]  ;;  %v904_v30 = vld [vmem:[#allocation2 + $0x378] sm:$0xff] }
 0x28f   : > { %941 = vmatpush.msra.mxu2 %v922_v13  ;;  %984 = vmatpush.msra.mxu0 %v915_v14  ;;  %v1095_v13 = vld [vmem:[#allocation2 + $0x5e0] sm:$0xff]  ;;  %v1070_v14 = vld [vmem:[#allocation2 + $0x518] sm:$0xff] }
 0x290   : > { %v750_v40 = vadd.f32 %v746_v36, %v724_v35  ;;  %v903_v36 = vld [vmem:[#allocation2 + $0x370] sm:$0xff] }
 0x291   : > { %942 = vmatpush.msra.mxu2 %v919_v17  ;;  %985 = vmatpush.msra.mxu0 %v912_v26  ;;  %v1082_v17 = vld [vmem:[#allocation2 + $0x578] sm:$0xff] }
 0x292   : > { %v757_v44 = vadd.f32 %v2232_v34, %v750_v40  ;;  %v902_v34 = vld [vmem:[#allocation2 + $0x368] sm:$0xff]  ;;  %v895_v40 = vld [vmem:[#allocation2 + $0x330] sm:$0xff]  ;;  %v1074_v26 = vld [vmem:[#allocation2 + $0x538] sm:$0xff] }
 0x293   : > { %943 = vmatpush.msra.mxu2 %v916_v20  ;;  %986 = vmatpush.msra.mxu0 %v909_v29  ;;  %v1086_v20 = vld [vmem:[#allocation2 + $0x598] sm:$0xff]  ;;  %v1063_v29 = vld [vmem:[#allocation2 + $0x4e0] sm:$0xff] }
 0x294   : > { %v759_v45 = vmax.f32 %v757_v44, 0.0 }
 0x295   : > { %944 = vmatpush.msra.mxu2 %v913_v23  ;;  %987 = vmatpush.msra.mxu0 %v906_v32  ;;  %v1073_v23 = vld [vmem:[#allocation2 + $0x530] sm:$0xff]  ;;  %v1060_v32 = vld [vmem:[#allocation2 + $0x4c8] sm:$0xff] }
 0x296   : > { %781 = vmatpush.msrb.mxu3 %v759_v45 }
 0x297   : > { %945 = vmatpush.msra.mxu2 %v910_v7  ;;  %988 = vmatpush.msra.mxu0 %v903_v36  ;;  %v1077_v7 = vld [vmem:[#allocation2 + $0x550] sm:$0xff]  ;;  %v1058_v36 = vld [vmem:[#allocation2 + $0x4b8] sm:$0xff] }
 0x298   : > { %782 = vmatpush.msrb.mxu3 %v758_v46 }
 0x299   : > { %2100 = vmatmul.msk.f32.vlgmr.msrb.gmra.mxu3 %vm508_vm1, %v2712_v51  ;;  %946 = vmatpush.msra.mxu2 %v907_v27  ;;  %v1071_v27 = vld [vmem:[#allocation2 + $0x520] sm:$0xff] }
 0x29a   : > { %808 = vmatpush.msra.mxu3 %v759_v45  ;;  %989 = vmatpush.msra.mxu0 %v900_v39  ;;  %v892_v45 = vld [vmem:[#allocation2 + $0x318] sm:$0xff]  ;;  %v1055_v39 = vld [vmem:[#allocation2 + $0x4a0] sm:$0xff] }
 0x29b   : > { %947 = vmatpush.msra.mxu2 %v904_v30  ;;  %v1064_v30 = vld [vmem:[#allocation2 + $0x4e8] sm:$0xff] }
 0x29c   : > { %809 = vmatpush.msra.mxu3 %v758_v46  ;;  %990 = vmatpush.msra.mxu0 %v897_v42  ;;  %v893_v46 = vld [vmem:[#allocation2 + $0x320] sm:$0xff]  ;;  %v1052_v42 = vld [vmem:[#allocation2 + $0x488] sm:$0xff] }
 0x29d   : > { %948 = vmatpush.msra.mxu2 %v901_v33  ;;  %v1061_v33 = vld [vmem:[#allocation2 + $0x4d0] sm:$0xff] }
 0x29e   : > { %957 = vmatpush.msrb.mxu3 %v935_v62  ;;  %991 = vmatpush.msra.mxu0 %v894_v47  ;;  %v1075_v62 = vld [vmem:[#allocation2 + $0x540] sm:$0xff] }
 0x29f   : > { %949 = vmatpush.msra.mxu2 %v898_v37  ;;  %1106 = vmatpush.msrb.mxu1 %v1075_v62  ;;  %v1059_v37 = vld [vmem:[#allocation2 + $0x4c0] sm:$0xff] }
 0x2a0   : > { %958 = vmatpush.msrb.mxu3 %v932_v3  ;;  %992 = vmatpush.msra.mxu0 %v891_v52  ;;  %v1066_v3 = vld [vmem:[#allocation2 + $0x4f8] sm:$0xff]  ;;  %v1302_v62 = vld [vmem:[#allocation8 + $0xe0] sm:$0xff] }
 0x2a1   : > { %2102 = vmatmul.msk.f32.vlgmr.msra.gmra.mxu3 %vm508_vm1, %v2718_v48  ;;  %950 = vmatpush.msra.mxu2 %v895_v40  ;;  %v1056_v40 = vld [vmem:[#allocation2 + $0x4a8] sm:$0xff] }
 0x2a2   : > { %959 = vmatpush.msrb.mxu3 %v929_v6  ;;  %1107 = vmatpush.msrb.mxu1 %v1072_v63  ;;  %v1094_v6 = vld [vmem:[#allocation2 + $0x5d8] sm:$0xff] }
 0x2a3   : > { %951 = vmatpush.msra.mxu2 %v892_v45  ;;  %v1264_v63 = vld [vmem:[#allocation7 + $0xd8] sm:$0xff] }
 0x2a4   : > { %960 = vmatpush.msrb.mxu3 %v926_v10  ;;  %1108 = vmatpush.msrb.mxu1 %v1069_v0  ;;  %v1098_v10 = vld [vmem:[#allocation2 + $0x5f8] sm:$0xff] }
 0x2a5   : > { %952 = vmatpush.msra.mxu2 %v889_v49  ;;  %v2233_v49 = vld [vmem:[#allocation5 + $0x2] ss:$0 sm:$0xff] }
 0x2a6   : > { %961 = vmatpush.msrb.mxu3 %v923_v15  ;;  %1109 = vmatpush.msrb.mxu1 %v1066_v3  ;;  %v1085_v15 = vld [vmem:[#allocation2 + $0x590] sm:$0xff]  ;;  %v1301_v0 = vld [vmem:[#allocation8 + $0xd8] sm:$0xff] }
 0x2a7   : > { %v1263_v3 = vld [vmem:[#allocation7 + $0xd0] sm:$0xff] }
 0x2a8   : > { %962 = vmatpush.msrb.mxu3 %v920_v18  ;;  %v1089_v18 = vld [vmem:[#allocation2 + $0x5b0] sm:$0xff]  ;;  %1110 = vmatpush.msrb.mxu1 %v1063_v29 }
 0x2a9   : > { %v1292_v29 = vld [vmem:[#allocation8 + $0x90] sm:$0xff] }
 0x2aa   : > { %963 = vmatpush.msrb.mxu3 %v917_v21  ;;  %v1076_v21 = vld [vmem:[#allocation2 + $0x548] sm:$0xff]  ;;  %1111 = vmatpush.msrb.mxu1 %v1060_v32 }
 0x2ab   : > { %v1253_v32 = vld [vmem:[#allocation7 + $0x80] sm:$0xff] }
 0x2ac   : > { %964 = vmatpush.msrb.mxu3 %v914_v24  ;;  %v1080_v24 = vld [vmem:[#allocation2 + $0x568] sm:$0xff] }
 0x2ae   : > { %965 = vmatpush.msrb.mxu3 %v911_v25  ;;  %v1067_v25 = vld [vmem:[#allocation2 + $0x500] sm:$0xff] }
 0x2b0   : > { %966 = vmatpush.msrb.mxu3 %v908_v28  ;;  %v1068_v28 = vld [vmem:[#allocation2 + $0x508] sm:$0xff] }
 0x2b2   : > { %967 = vmatpush.msrb.mxu3 %v905_v31  ;;  %v1065_v31 = vld [vmem:[#allocation2 + $0x4f0] sm:$0xff] }
 0x2b4   : > { %968 = vmatpush.msrb.mxu3 %v902_v34  ;;  %v1062_v34 = vld [vmem:[#allocation2 + $0x4d8] sm:$0xff] }
 0x2b6   : > { %969 = vmatpush.msrb.mxu3 %v899_v38  ;;  %v1054_v38 = vld [vmem:[#allocation2 + $0x498] sm:$0xff] }
 0x2b8   : > { %970 = vmatpush.msrb.mxu3 %v896_v41  ;;  %v1051_v41 = vld [vmem:[#allocation2 + $0x480] sm:$0xff] }
 0x2ba   : > { %971 = vmatpush.msrb.mxu3 %v893_v46 }
 0x2bc   : > { %972 = vmatpush.msrb.mxu3 %v890_v50 }
 0x31c   : > { %v784_v35 = vpop.f32.mrf.mxu3 }
 0x324   : > { %v811_v43 = vpop.f32.mrf.mxu3 }
 0x325   : > { %v814_v44 = vmax.f32 %v784_v35, %v811_v43  ;;  %v1057_v35 = vld [vmem:[#allocation2 + $0x4b0] sm:$0xff] }
 0x326   : > { %1112 = vmatpush.msrb.mxu1 %v1057_v35  ;;  %v1053_v43 = vld [vmem:[#allocation2 + $0x490] sm:$0xff] }
 0x327   : > { %847 = vmatmul.f32.vlgmr.msrb.gmra.mxu0 %v814_v44  ;;  %883 = vmatmul.f32.vlgmr.msra.gmra.mxu1 %v814_v44  ;;  %v1374_v35 = vld [vmem:[#allocation2 + $0x770] sm:$0xff] }
 0x328   : > { %1113 = vmatpush.msrb.mxu1 %v1054_v38  ;;  %v1371_v38 = vld [vmem:[#allocation2 + $0x758] sm:$0xff] }
 0x32a   : > { %1114 = vmatpush.msrb.mxu1 %v1051_v41  ;;  %v1368_v41 = vld [vmem:[#allocation2 + $0x740] sm:$0xff] }
 0x3a4   : > { %v848_v54 = vpop.f32.mrf.mxu0  ;;  %v884_v55 = vpop.f32.mrf.mxu1 }
 0x3a5   : > { %v887_v56 = vmax.f32 %v848_v54, %v884_v55 }
 0x3a7   : > { %953 = vmatmul.f32.vlgmr.msra.gmra.mxu2 %v887_v56  ;;  %973 = vmatmul.f32.vlgmr.msrb.gmra.mxu3 %v887_v56 }
 0x3a8   : > { %993 = vmatmul.f32.vlgmr.msra.gmra.mxu0 %v887_v56 }
 0x425   : > { %v994_v4 = vpop.f32.mrf.mxu0 }
 0x426   : > { %1037 = vmatpush.msrb.mxu2 %v994_v4  ;;  %v1300_v4 = vld [vmem:[#allocation8 + $0xd0] sm:$0xff] }
 0x427   : > { %2104 = vmatmul.msk.f32.vlgmr.msrb.gmra.mxu2 %vm997_vm7, %v2691_v12 }
 0x428   : > { %1119 = vmatpush.msra.mxu2 %v1097_v5  ;;  %v1262_v5 = vld [vmem:[#allocation7 + $0xc8] sm:$0xff] }
 0x42a   : > { %v954_v9 = vpop.f32.mrf.mxu2  ;;  %1120 = vmatpush.msra.mxu2 %v1094_v6  ;;  %v974_v44 = vpop.f32.mrf.mxu3  ;;  %v1299_v6 = vld [vmem:[#allocation8 + $0xc8] sm:$0xff] }
 0x42b   : > { %1015 = vmatpush.msra.mxu3 %v954_v9  ;;  %v1298_v9 = vld [vmem:[#allocation8 + $0xc0] sm:$0xff] }
 0x42c   : > { %2103 = vmatmul.msk.f32.vlgmr.msra.gmra.mxu3 %vm997_vm7, %v2678_v2  ;;  %1121 = vmatpush.msra.mxu2 %v1091_v8  ;;  %v1261_v8 = vld [vmem:[#allocation7 + $0xc0] sm:$0xff] }
 0x42d   : > { %1139 = vmatpush.msrb.mxu3 %v1098_v10  ;;  %v1260_v10 = vld [vmem:[#allocation7 + $0xb8] sm:$0xff] }
 0x42e   : > { %1122 = vmatpush.msra.mxu2 %v1088_v11  ;;  %v1297_v11 = vld [vmem:[#allocation8 + $0xb8] sm:$0xff] }
 0x42f   : > { %1140 = vmatpush.msrb.mxu3 %v1095_v13  ;;  %v1259_v13 = vld [vmem:[#allocation7 + $0xb0] sm:$0xff] }
 0x430   : > { %1123 = vmatpush.msra.mxu2 %v1085_v15  ;;  %v1296_v15 = vld [vmem:[#allocation8 + $0xb0] sm:$0xff] }
 0x431   : > { %1141 = vmatpush.msrb.mxu3 %v1092_v16  ;;  %v1258_v16 = vld [vmem:[#allocation7 + $0xa8] sm:$0xff] }
 0x432   : > { %1124 = vmatpush.msra.mxu2 %v1082_v17  ;;  %v1295_v17 = vld [vmem:[#allocation8 + $0xa8] sm:$0xff] }
 0x433   : > { %1142 = vmatpush.msrb.mxu3 %v1089_v18  ;;  %v1257_v18 = vld [vmem:[#allocation7 + $0xa0] sm:$0xff] }
 0x434   : > { %1125 = vmatpush.msra.mxu2 %v1079_v19 }
 0x435   : > { %1143 = vmatpush.msrb.mxu3 %v1086_v20 }
 0x436   : > { %1126 = vmatpush.msra.mxu2 %v1076_v21  ;;  %v1256_v21 = vld [vmem:[#allocation7 + $0x98] sm:$0xff] }
 0x437   : > { %1144 = vmatpush.msrb.mxu3 %v1083_v22 }
 0x438   : > { %1127 = vmatpush.msra.mxu2 %v1073_v23 }
 0x439   : > { %1145 = vmatpush.msrb.mxu3 %v1080_v24  ;;  %v2234_v24 = vld [vmem:[#allocation5 + $0x3] ss:$0 sm:$0xff] }
 0x43a   : > { %1128 = vmatpush.msra.mxu2 %v1070_v14  ;;  %v1255_v14 = vld [vmem:[#allocation7 + $0x90] sm:$0xff] }
 0x43b   : > { %1146 = vmatpush.msrb.mxu3 %v1077_v7 }
 0x43c   : > { %1129 = vmatpush.msra.mxu2 %v1067_v25 }
 0x43d   : > { %1147 = vmatpush.msrb.mxu3 %v1074_v26 }
 0x43e   : > { %1130 = vmatpush.msra.mxu2 %v1064_v30  ;;  %v1254_v30 = vld [vmem:[#allocation7 + $0x88] sm:$0xff] }
 0x43f   : > { %1148 = vmatpush.msrb.mxu3 %v1071_v27  ;;  %v1294_v27 = vld [vmem:[#allocation8 + $0xa0] sm:$0xff] }
 0x440   : > { %1131 = vmatpush.msra.mxu2 %v1061_v33  ;;  %v1290_v33 = vld [vmem:[#allocation8 + $0x80] sm:$0xff] }
 0x441   : > { %1149 = vmatpush.msrb.mxu3 %v1068_v28  ;;  %v1293_v28 = vld [vmem:[#allocation8 + $0x98] sm:$0xff] }
 0x442   : > { %1132 = vmatpush.msra.mxu2 %v1058_v36  ;;  %v1375_v36 = vld [vmem:[#allocation2 + $0x778] sm:$0xff] }
 0x443   : > { %1150 = vmatpush.msrb.mxu3 %v1065_v31  ;;  %v1291_v31 = vld [vmem:[#allocation8 + $0x88] sm:$0xff] }
 0x444   : > { %1133 = vmatpush.msra.mxu2 %v1055_v39  ;;  %v1372_v39 = vld [vmem:[#allocation2 + $0x760] sm:$0xff] }
 0x445   : > { %1151 = vmatpush.msrb.mxu3 %v1062_v34  ;;  %v1373_v34 = vld [vmem:[#allocation2 + $0x768] sm:$0xff] }
 0x446   : > { %1134 = vmatpush.msra.mxu2 %v1052_v42  ;;  %v1369_v42 = vld [vmem:[#allocation2 + $0x748] sm:$0xff] }
 0x447   : > { %1152 = vmatpush.msrb.mxu3 %v1059_v37  ;;  %v1370_v37 = vld [vmem:[#allocation2 + $0x750] sm:$0xff] }
 0x449   : > { %1153 = vmatpush.msrb.mxu3 %v1056_v40  ;;  %v1367_v40 = vld [vmem:[#allocation2 + $0x738] sm:$0xff] }
 0x44b   : > { %1154 = vmatpush.msrb.mxu3 %v1053_v43  ;;  %v1364_v43 = vld [vmem:[#allocation2 + $0x720] sm:$0xff] }
 0x4aa   : > { %v1039_v46 = vpop.f32.mrf.mxu2 }
 0x4af   : > { %v1017_v45 = vpop.f32.mrf.mxu3 }
 0x4b0   : > { %v1018_v47 = vadd.f32 %v1017_v45, %v974_v44  ;;  %v1365_v44 = vld [vmem:[#allocation2 + $0x728] sm:$0xff]  ;;  %v1366_v45 = vld [vmem:[#allocation2 + $0x730] sm:$0xff] }
 0x4b2   : > { %v1042_v50 = vadd.f32 %v1039_v46, %v1018_v47  ;;  %v1361_v46 = vld [vmem:[#allocation2 + $0x708] sm:$0xff]  ;;  %v1362_v47 = vld [vmem:[#allocation2 + $0x710] sm:$0xff] }
 0x4b4   : > { %v1048_v52 = vadd.f32 %v2233_v49, %v1042_v50  ;;  %v1363_v49 = vld [vmem:[#allocation2 + $0x718] sm:$0xff]  ;;  %v1358_v50 = vld [vmem:[#allocation2 + $0x6f0] sm:$0xff] }
 0x4b6   : > { %v1049_v54 = vmax.f32 %v1048_v52, 0.0  ;;  %v1359_v52 = vld [vmem:[#allocation2 + $0x6f8] sm:$0xff] }
 0x4b8   : > { %1115 = vmatmul.f32.vlgmr.msrb.gmra.mxu1 %v1049_v54  ;;  %1135 = vmatmul.f32.vlgmr.msra.gmra.mxu2 %v1049_v54 }
 0x4b9   : > { %1155 = vmatmul.f32.vlgmr.msrb.gmra.mxu3 %v1049_v54  ;;  %v1360_v54 = vld [vmem:[#allocation2 + $0x700] sm:$0xff] }
 0x535   : > { %v1116_v55 = vpop.f32.mrf.mxu1 }
 0x536   : > { %1174 = vmatpush.msra.mxu3 %v1116_v55  ;;  %v1355_v55 = vld [vmem:[#allocation2 + $0x6d8] sm:$0xff] }
 0x537   : > { %2105 = vmatmul.msk.f32.vlgmr.msra.gmra.mxu3 %vm997_vm7, %v2678_v2 }
 0x538   : > { %1269 = vmatpush.msrb.mxu3 %v1268_v57  ;;  %v1357_v57 = vld [vmem:[#allocation2 + $0x6e8] sm:$0xff] }
 0x53a   : > { %1270 = vmatpush.msrb.mxu3 %v1267_v58  ;;  %v1352_v58 = vld [vmem:[#allocation2 + $0x6c0] sm:$0xff] }
 0x53b   : > { %v1136_v19 = vpop.f32.mrf.mxu2 }
 0x53c   : > { %v1156_v56 = vpop.f32.mrf.mxu3  ;;  %1271 = vmatpush.msrb.mxu3 %v1266_v1  ;;  %v1354_v1 = vld [vmem:[#allocation2 + $0x6d0] sm:$0xff] }
 0x53d   : > { %1194 = vmatpush.msrb.mxu0 %v1156_v56  ;;  %v1356_v56 = vld [vmem:[#allocation2 + $0x6e0] sm:$0xff] }
 0x53e   : > { %2106 = vmatmul.msk.f32.vlgmr.msrb.gmra.mxu0 %vm997_vm7, %v2691_v12  ;;  %1272 = vmatpush.msrb.mxu3 %v1265_v61  ;;  %v1351_v61 = vld [vmem:[#allocation2 + $0x6b8] sm:$0xff] }
 0x53f   : > { %1306 = vmatpush.msra.mxu0 %v1305_v53  ;;  %v1353_v53 = vld [vmem:[#allocation2 + $0x6c8] sm:$0xff] }
 0x540   : > { %1273 = vmatpush.msrb.mxu3 %v1264_v63  ;;  %v1347_v63 = vld [vmem:[#allocation2 + $0x698] sm:$0xff] }
 0x541   : > { %1307 = vmatpush.msra.mxu0 %v1304_v59  ;;  %v1349_v59 = vld [vmem:[#allocation2 + $0x6a8] sm:$0xff] }
 0x542   : > { %1274 = vmatpush.msrb.mxu3 %v1263_v3  ;;  %v1343_v3 = vld [vmem:[#allocation2 + $0x678] sm:$0xff] }
 0x543   : > { %1308 = vmatpush.msra.mxu0 %v1303_v60  ;;  %v1350_v60 = vld [vmem:[#allocation2 + $0x6b0] sm:$0xff] }
 0x544   : > { %1275 = vmatpush.msrb.mxu3 %v1262_v5  ;;  %v1345_v5 = vld [vmem:[#allocation2 + $0x688] sm:$0xff] }
 0x545   : > { %1309 = vmatpush.msra.mxu0 %v1302_v62  ;;  %v1346_v62 = vld [vmem:[#allocation2 + $0x690] sm:$0xff] }
 0x546   : > { %1276 = vmatpush.msrb.mxu3 %v1261_v8  ;;  %v1341_v8 = vld [vmem:[#allocation2 + $0x668] sm:$0xff] }
 0x547   : > { %1310 = vmatpush.msra.mxu0 %v1301_v0  ;;  %v1348_v0 = vld [vmem:[#allocation2 + $0x6a0] sm:$0xff] }
 0x548   : > { %1277 = vmatpush.msrb.mxu3 %v1260_v10  ;;  %v1337_v10 = vld [vmem:[#allocation2 + $0x648] sm:$0xff] }
 0x549   : > { %1311 = vmatpush.msra.mxu0 %v1300_v4  ;;  %v1344_v4 = vld [vmem:[#allocation2 + $0x680] sm:$0xff] }
 0x54a   : > { %1278 = vmatpush.msrb.mxu3 %v1259_v13  ;;  %v1339_v13 = vld [vmem:[#allocation2 + $0x658] sm:$0xff] }
 0x54b   : > { %1312 = vmatpush.msra.mxu0 %v1299_v6  ;;  %v1340_v6 = vld [vmem:[#allocation2 + $0x660] sm:$0xff] }
 0x54c   : > { %1279 = vmatpush.msrb.mxu3 %v1258_v16  ;;  %v1335_v16 = vld [vmem:[#allocation2 + $0x638] sm:$0xff] }
 0x54d   : > { %1313 = vmatpush.msra.mxu0 %v1298_v9  ;;  %v1342_v9 = vld [vmem:[#allocation2 + $0x670] sm:$0xff] }
 0x54e   : > { %1280 = vmatpush.msrb.mxu3 %v1257_v18 }
 0x54f   : > { %1314 = vmatpush.msra.mxu0 %v1297_v11  ;;  %v1338_v11 = vld [vmem:[#allocation2 + $0x650] sm:$0xff] }
 0x550   : > { %1281 = vmatpush.msrb.mxu3 %v1256_v21  ;;  %v1331_v21 = vld [vmem:[#allocation2 + $0x618] sm:$0xff] }
 0x551   : > { %1315 = vmatpush.msra.mxu0 %v1296_v15  ;;  %v1334_v15 = vld [vmem:[#allocation2 + $0x630] sm:$0xff] }
 0x552   : > { %1282 = vmatpush.msrb.mxu3 %v1255_v14  ;;  %v1329_v14 = vld [vmem:[#allocation2 + $0x608] sm:$0xff] }
 0x553   : > { %1316 = vmatpush.msra.mxu0 %v1295_v17  ;;  %v1336_v17 = vld [vmem:[#allocation2 + $0x640] sm:$0xff] }
 0x554   : > { %1283 = vmatpush.msrb.mxu3 %v1254_v30  ;;  %v1536_v30 = vld [vmem:[#allocation2 + $0x8b8] sm:$0xff] }
 0x555   : > { %1317 = vmatpush.msra.mxu0 %v1294_v27 }
 0x556   : > { %1284 = vmatpush.msrb.mxu3 %v1253_v32  ;;  %v1530_v32 = vld [vmem:[#allocation2 + $0x888] sm:$0xff] }
 0x557   : > { %1318 = vmatpush.msra.mxu0 %v1293_v28  ;;  %v1542_v28 = vld [vmem:[#allocation2 + $0x8e8] sm:$0xff] }
 0x558   : > { %1416 = vmatpush.msra.mxu3 %v1375_v36  ;;  %v1518_v36 = vld [vmem:[#allocation2 + $0x828] sm:$0xff] }
 0x559   : > { %1319 = vmatpush.msra.mxu0 %v1292_v29  ;;  %v1539_v29 = vld [vmem:[#allocation2 + $0x8d0] sm:$0xff] }
 0x55a   : > { %1417 = vmatpush.msra.mxu3 %v1372_v39  ;;  %v1540_v39 = vld [vmem:[#allocation2 + $0x8d8] sm:$0xff] }
 0x55b   : > { %1320 = vmatpush.msra.mxu0 %v1291_v31  ;;  %v1533_v31 = vld [vmem:[#allocation2 + $0x8a0] sm:$0xff] }
 0x55c   : > { %1418 = vmatpush.msra.mxu3 %v1369_v42 }
 0x55d   : > { %1321 = vmatpush.msra.mxu0 %v1290_v33  ;;  %v1527_v33 = vld [vmem:[#allocation2 + $0x870] sm:$0xff] }
 0x55e   : > { %1419 = vmatpush.msra.mxu3 %v1366_v45  ;;  %v1541_v45 = vld [vmem:[#allocation2 + $0x8e0] sm:$0xff] }
 0x560   : > { %1420 = vmatpush.msra.mxu3 %v1363_v49  ;;  %v1525_v49 = vld [vmem:[#allocation2 + $0x860] sm:$0xff] }
 0x562   : > { %1421 = vmatpush.msra.mxu3 %v1360_v54  ;;  %v1532_v54 = vld [vmem:[#allocation2 + $0x898] sm:$0xff] }
 0x564   : > { %1422 = vmatpush.msra.mxu3 %v1357_v57  ;;  %v1526_v57 = vld [vmem:[#allocation2 + $0x868] sm:$0xff] }
 0x566   : > { %1423 = vmatpush.msra.mxu3 %v1354_v1  ;;  %v1515_v1 = vld [vmem:[#allocation2 + $0x810] sm:$0xff] }
 0x568   : > { %1424 = vmatpush.msra.mxu3 %v1351_v61  ;;  %v1512_v61 = vld [vmem:[#allocation2 + $0x7f8] sm:$0xff] }
 0x56a   : > { %1425 = vmatpush.msra.mxu3 %v1348_v0  ;;  %v1509_v0 = vld [vmem:[#allocation2 + $0x7e0] sm:$0xff] }
 0x56c   : > { %1426 = vmatpush.msra.mxu3 %v1345_v5  ;;  %v1506_v5 = vld [vmem:[#allocation2 + $0x7c8] sm:$0xff] }
 0x56e   : > { %1427 = vmatpush.msra.mxu3 %v1342_v9  ;;  %v1503_v9 = vld [vmem:[#allocation2 + $0x7b0] sm:$0xff] }
 0x570   : > { %1428 = vmatpush.msra.mxu3 %v1339_v13  ;;  %v1500_v13 = vld [vmem:[#allocation2 + $0x798] sm:$0xff] }
 0x572   : > { %1429 = vmatpush.msra.mxu3 %v1336_v17  ;;  %v1497_v17 = vld [vmem:[#allocation2 + $0x780] sm:$0xff] }
 0x5ba   : > { %v1176_v20 = vpop.f32.mrf.mxu3 }
 0x5bb   : > { %v1177_v22 = vadd.f32 %v1176_v20, %v1136_v19  ;;  %v1196_v23 = vpop.f32.mrf.mxu0 }
 0x5bd   : > { %v1199_v7 = vadd.f32 %v1196_v23, %v1177_v22  ;;  %v1332_v22 = vld [vmem:[#allocation2 + $0x620] sm:$0xff]  ;;  %v1333_v23 = vld [vmem:[#allocation2 + $0x628] sm:$0xff] }
 0x5be   : > { %1430 = vmatpush.msra.mxu3 %v1333_v23  ;;  %v2235_v23 = vld [vmem:[#allocation5 + $0x4] ss:$0 sm:$0xff] }
 0x5bf   : > { %v1205_v25 = vadd.f32 %v2234_v24, %v1199_v7  ;;  %v1328_v24 = vld [vmem:[#allocation2 + $0x600] sm:$0xff]  ;;  %v1330_v7 = vld [vmem:[#allocation2 + $0x610] sm:$0xff] }
 0x5c0   : > { %1431 = vmatpush.msra.mxu3 %v1330_v7 }
 0x5c1   : > { %v1206_v26 = vmax.f32 %v1205_v25, 0.0 }
 0x5c3   : > { %1224 = vmatpush.msra.mxu1 %v1206_v26  ;;  %1246 = vmatpush.msrb.mxu2 %v1206_v26 }
 0x5c4   : > { %2108 = vmatmul.msk.f32.vlgmr.msrb.gmra.mxu2 %vm997_vm7, %v2718_v48  ;;  %2107 = vmatmul.msk.f32.vlgmr.msra.gmra.mxu1 %vm997_vm7, %v2712_v51 }
 0x5c5   : > { %1376 = vmatpush.msrb.mxu1 %v1373_v34  ;;  %1396 = vmatpush.msra.mxu2 %v1374_v35  ;;  %v1524_v34 = vld [vmem:[#allocation2 + $0x858] sm:$0xff]  ;;  %v1521_v35 = vld [vmem:[#allocation2 + $0x840] sm:$0xff] }
 0x5c7   : > { %1377 = vmatpush.msrb.mxu1 %v1370_v37  ;;  %1397 = vmatpush.msra.mxu2 %v1371_v38  ;;  %v1543_v38 = vld [vmem:[#allocation2 + $0x8f0] sm:$0xff] }
 0x5c9   : > { %1378 = vmatpush.msrb.mxu1 %v1367_v40  ;;  %1398 = vmatpush.msra.mxu2 %v1368_v41  ;;  %v1537_v40 = vld [vmem:[#allocation2 + $0x8c0] sm:$0xff]  ;;  %v1534_v41 = vld [vmem:[#allocation2 + $0x8a8] sm:$0xff] }
 0x5cb   : > { %1379 = vmatpush.msrb.mxu1 %v1364_v43  ;;  %1399 = vmatpush.msra.mxu2 %v1365_v44  ;;  %v1544_v43 = vld [vmem:[#allocation2 + $0x8f8] sm:$0xff]  ;;  %v1531_v44 = vld [vmem:[#allocation2 + $0x890] sm:$0xff] }
 0x5cd   : > { %1380 = vmatpush.msrb.mxu1 %v1361_v46  ;;  %1400 = vmatpush.msra.mxu2 %v1362_v47  ;;  %v1528_v46 = vld [vmem:[#allocation2 + $0x878] sm:$0xff]  ;;  %v1538_v47 = vld [vmem:[#allocation2 + $0x8c8] sm:$0xff] }
 0x5cf   : > { %1381 = vmatpush.msrb.mxu1 %v1358_v50  ;;  %1401 = vmatpush.msra.mxu2 %v1359_v52  ;;  %v1535_v50 = vld [vmem:[#allocation2 + $0x8b0] sm:$0xff]  ;;  %v1522_v52 = vld [vmem:[#allocation2 + $0x848] sm:$0xff] }
 0x5d1   : > { %1382 = vmatpush.msrb.mxu1 %v1355_v55  ;;  %1402 = vmatpush.msra.mxu2 %v1356_v56  ;;  %v1519_v55 = vld [vmem:[#allocation2 + $0x830] sm:$0xff]  ;;  %v1529_v56 = vld [vmem:[#allocation2 + $0x880] sm:$0xff] }
 0x5d3   : > { %1383 = vmatpush.msrb.mxu1 %v1352_v58  ;;  %1403 = vmatpush.msra.mxu2 %v1353_v53  ;;  %v1523_v58 = vld [vmem:[#allocation2 + $0x850] sm:$0xff]  ;;  %v1520_v53 = vld [vmem:[#allocation2 + $0x838] sm:$0xff] }
 0x5d5   : > { %1384 = vmatpush.msrb.mxu1 %v1349_v59  ;;  %1404 = vmatpush.msra.mxu2 %v1350_v60  ;;  %v1516_v59 = vld [vmem:[#allocation2 + $0x818] sm:$0xff]  ;;  %v1517_v60 = vld [vmem:[#allocation2 + $0x820] sm:$0xff] }
 0x5d7   : > { %1385 = vmatpush.msrb.mxu1 %v1346_v62  ;;  %1405 = vmatpush.msra.mxu2 %v1347_v63  ;;  %v1513_v62 = vld [vmem:[#allocation2 + $0x800] sm:$0xff]  ;;  %v1514_v63 = vld [vmem:[#allocation2 + $0x808] sm:$0xff] }
 0x5d9   : > { %1386 = vmatpush.msrb.mxu1 %v1343_v3  ;;  %1406 = vmatpush.msra.mxu2 %v1344_v4  ;;  %v1510_v3 = vld [vmem:[#allocation2 + $0x7e8] sm:$0xff]  ;;  %v1511_v4 = vld [vmem:[#allocation2 + $0x7f0] sm:$0xff] }
 0x5db   : > { %1387 = vmatpush.msrb.mxu1 %v1340_v6  ;;  %1407 = vmatpush.msra.mxu2 %v1341_v8  ;;  %v1507_v6 = vld [vmem:[#allocation2 + $0x7d0] sm:$0xff]  ;;  %v1508_v8 = vld [vmem:[#allocation2 + $0x7d8] sm:$0xff] }
 0x5dd   : > { %1388 = vmatpush.msrb.mxu1 %v1337_v10  ;;  %1408 = vmatpush.msra.mxu2 %v1338_v11  ;;  %v1504_v10 = vld [vmem:[#allocation2 + $0x7b8] sm:$0xff]  ;;  %v1505_v11 = vld [vmem:[#allocation2 + $0x7c0] sm:$0xff] }
 0x5df   : > { %1389 = vmatpush.msrb.mxu1 %v1334_v15  ;;  %1409 = vmatpush.msra.mxu2 %v1335_v16  ;;  %v1501_v15 = vld [vmem:[#allocation2 + $0x7a0] sm:$0xff]  ;;  %v1502_v16 = vld [vmem:[#allocation2 + $0x7a8] sm:$0xff] }
 0x5e1   : > { %1390 = vmatpush.msrb.mxu1 %v1331_v21  ;;  %1410 = vmatpush.msra.mxu2 %v1332_v22 }
 0x5e3   : > { %1391 = vmatpush.msrb.mxu1 %v1328_v24  ;;  %1411 = vmatpush.msra.mxu2 %v1329_v14 }
 0x5e5   : > { %1545 = vmatpush.msrb.mxu2 %v1542_v28  ;;  %v1760_v28 = vld [vmem:[#allocation8 + $0x178] sm:$0xff] }
 0x5e7   : > { %1546 = vmatpush.msrb.mxu2 %v1539_v29  ;;  %v1759_v29 = vld [vmem:[#allocation8 + $0x170] sm:$0xff] }
 0x5e9   : > { %1547 = vmatpush.msrb.mxu2 %v1536_v30  ;;  %v1723_v30 = vld [vmem:[#allocation7 + $0x178] sm:$0xff] }
 0x5eb   : > { %1548 = vmatpush.msrb.mxu2 %v1533_v31  ;;  %v1722_v31 = vld [vmem:[#allocation7 + $0x170] sm:$0xff] }
 0x5ed   : > { %1549 = vmatpush.msrb.mxu2 %v1530_v32  ;;  %v1758_v32 = vld [vmem:[#allocation8 + $0x168] sm:$0xff] }
 0x5ef   : > { %1550 = vmatpush.msrb.mxu2 %v1527_v33  ;;  %v1721_v33 = vld [vmem:[#allocation7 + $0x168] sm:$0xff] }
 0x5f1   : > { %1551 = vmatpush.msrb.mxu2 %v1524_v34  ;;  %v1757_v34 = vld [vmem:[#allocation8 + $0x160] sm:$0xff] }
 0x5f3   : > { %1552 = vmatpush.msrb.mxu2 %v1521_v35  ;;  %v1720_v35 = vld [vmem:[#allocation7 + $0x160] sm:$0xff] }
 0x5f5   : > { %1553 = vmatpush.msrb.mxu2 %v1518_v36  ;;  %v1719_v36 = vld [vmem:[#allocation7 + $0x158] sm:$0xff] }
 0x5f7   : > { %1554 = vmatpush.msrb.mxu2 %v1515_v1 }
 0x5f9   : > { %1555 = vmatpush.msrb.mxu2 %v1512_v61  ;;  %v1711_v61 = vld [vmem:[#allocation7 + $0x118] sm:$0xff] }
 0x5fb   : > { %1556 = vmatpush.msrb.mxu2 %v1509_v0  ;;  %v1709_v0 = vld [vmem:[#allocation7 + $0x108] sm:$0xff] }
 0x5fd   : > { %1557 = vmatpush.msrb.mxu2 %v1506_v5  ;;  %v1814_v5 = vld [vmem:[#allocation10 + $0xf8] sm:$0xff] }
 0x5ff   : > { %1558 = vmatpush.msrb.mxu2 %v1503_v9  ;;  %v1795_v9 = vld [vmem:[#allocation10 + $0x68] sm:$0xff] }
 0x601   : > { %1559 = vmatpush.msrb.mxu2 %v1500_v13  ;;  %v1810_v13 = vld [vmem:[#allocation10 + $0xd8] sm:$0xff] }
 0x603   : > { %1560 = vmatpush.msrb.mxu2 %v1497_v17  ;;  %v1792_v17 = vld [vmem:[#allocation10 + $0x50] sm:$0xff] }
 0x641   : > { %v1226_v18 = vpop.f32.mrf.mxu1 }
 0x647   : > { %v1248_v19 = vpop.f32.mrf.mxu2 }
 0x648   : > { %v1251_v20 = vmax.f32 %v1226_v18, %v1248_v19  ;;  %v1498_v18 = vld [vmem:[#allocation2 + $0x788] sm:$0xff]  ;;  %v1499_v19 = vld [vmem:[#allocation2 + $0x790] sm:$0xff] }
 0x64a   : > { %1285 = vmatmul.f32.vlgmr.msrb.gmra.mxu3 %v1251_v20  ;;  %1322 = vmatmul.f32.vlgmr.msra.gmra.mxu0 %v1251_v20 }
 0x6c7   : > { %v1323_v26 = vpop.f32.mrf.mxu0 }
 0x6cd   : > { %v1286_v25 = vpop.f32.mrf.mxu3 }
 0x6ce   : > { %v1326_v27 = vmax.f32 %v1286_v25, %v1323_v26 }
 0x6d0   : > { %1392 = vmatmul.f32.vlgmr.msrb.gmra.mxu1 %v1326_v27  ;;  %1412 = vmatmul.f32.vlgmr.msra.gmra.mxu2 %v1326_v27 }
 0x6d1   : > { %1432 = vmatmul.f32.vlgmr.msra.gmra.mxu3 %v1326_v27 }
 0x74d   : > { %v1393_v37 = vpop.f32.mrf.mxu1 }
 0x74e   : > { %2109 = vmatpush.msk.msrb.mxu0 %vm1439_vm8, %v1393_v37  ;;  %v1755_v37 = vld [vmem:[#allocation8 + $0x150] sm:$0xff] }
 0x74f   : > { %2110 = vmatmul.msk.f32.vlgmr.msrb.gmra.mxu0 %vm1436_vm9, %v2678_v2 }
 0x750   : > { %1565 = vmatpush.msra.mxu0 %v1543_v38  ;;  %v1754_v38 = vld [vmem:[#allocation8 + $0x148] sm:$0xff] }
 0x752   : > { %1566 = vmatpush.msra.mxu0 %v1540_v39  ;;  %v1717_v39 = vld [vmem:[#allocation7 + $0x148] sm:$0xff] }
 0x753   : > { %v1413_v21 = vpop.f32.mrf.mxu2 }
 0x754   : > { %v1433_v42 = vpop.f32.mrf.mxu3  ;;  %1567 = vmatpush.msra.mxu0 %v1537_v40  ;;  %v1753_v40 = vld [vmem:[#allocation8 + $0x140] sm:$0xff] }
 0x755   : > { %2111 = vmatpush.msk.msra.mxu1 %vm1439_vm8, %v1433_v42  ;;  %v1752_v42 = vld [vmem:[#allocation8 + $0x138] sm:$0xff] }
 0x756   : > { %2112 = vmatmul.msk.f32.vlgmr.msra.gmra.mxu1 %vm1436_vm9, %v2691_v12  ;;  %1568 = vmatpush.msra.mxu0 %v1534_v41  ;;  %v1716_v41 = vld [vmem:[#allocation7 + $0x140] sm:$0xff] }
 0x757   : > { %1585 = vmatpush.msrb.mxu1 %v1544_v43  ;;  %v1715_v43 = vld [vmem:[#allocation7 + $0x138] sm:$0xff] }
 0x758   : > { %1569 = vmatpush.msra.mxu0 %v1531_v44  ;;  %v1751_v44 = vld [vmem:[#allocation8 + $0x130] sm:$0xff] }
 0x759   : > { %1586 = vmatpush.msrb.mxu1 %v1541_v45  ;;  %v1714_v45 = vld [vmem:[#allocation7 + $0x130] sm:$0xff] }
 0x75a   : > { %1570 = vmatpush.msra.mxu0 %v1528_v46  ;;  %v1750_v46 = vld [vmem:[#allocation8 + $0x128] sm:$0xff] }
 0x75b   : > { %1587 = vmatpush.msrb.mxu1 %v1538_v47  ;;  %v1713_v47 = vld [vmem:[#allocation7 + $0x128] sm:$0xff] }
 0x75c   : > { %1571 = vmatpush.msra.mxu0 %v1525_v49  ;;  %v1749_v49 = vld [vmem:[#allocation8 + $0x120] sm:$0xff] }
 0x75d   : > { %1588 = vmatpush.msrb.mxu1 %v1535_v50 }
 0x75e   : > { %1572 = vmatpush.msra.mxu0 %v1522_v52 }
 0x75f   : > { %1589 = vmatpush.msrb.mxu1 %v1532_v54 }
 0x760   : > { %1573 = vmatpush.msra.mxu0 %v1519_v55  ;;  %v1748_v55 = vld [vmem:[#allocation8 + $0x118] sm:$0xff] }
 0x761   : > { %1590 = vmatpush.msrb.mxu1 %v1529_v56 }
 0x762   : > { %1574 = vmatpush.msra.mxu0 %v1516_v59 }
 0x763   : > { %1591 = vmatpush.msrb.mxu1 %v1526_v57  ;;  %v2236_v57 = vld [vmem:[#allocation5 + $0x5] ss:$0 sm:$0xff] }
 0x764   : > { %1575 = vmatpush.msra.mxu0 %v1513_v62  ;;  %v1710_v62 = vld [vmem:[#allocation7 + $0x110] sm:$0xff] }
 0x765   : > { %1592 = vmatpush.msrb.mxu1 %v1523_v58  ;;  %v1747_v58 = vld [vmem:[#allocation8 + $0x110] sm:$0xff] }
 0x766   : > { %1576 = vmatpush.msra.mxu0 %v1510_v3  ;;  %v1745_v3 = vld [vmem:[#allocation8 + $0x100] sm:$0xff] }
 0x767   : > { %1593 = vmatpush.msrb.mxu1 %v1520_v53 }
 0x768   : > { %1577 = vmatpush.msra.mxu0 %v1507_v6  ;;  %v1813_v6 = vld [vmem:[#allocation10 + $0xf0] sm:$0xff] }
 0x769   : > { %1594 = vmatpush.msrb.mxu1 %v1517_v60  ;;  %v1712_v60 = vld [vmem:[#allocation7 + $0x120] sm:$0xff] }
 0x76a   : > { %1578 = vmatpush.msra.mxu0 %v1504_v10  ;;  %v1811_v10 = vld [vmem:[#allocation10 + $0xe0] sm:$0xff] }
 0x76b   : > { %1595 = vmatpush.msrb.mxu1 %v1514_v63  ;;  %v1746_v63 = vld [vmem:[#allocation8 + $0x108] sm:$0xff] }
 0x76c   : > { %1579 = vmatpush.msra.mxu0 %v1501_v15  ;;  %v1793_v15 = vld [vmem:[#allocation10 + $0x58] sm:$0xff] }
 0x76d   : > { %1596 = vmatpush.msrb.mxu1 %v1511_v4  ;;  %v1708_v4 = vld [vmem:[#allocation7 + $0x100] sm:$0xff] }
 0x76e   : > { %1580 = vmatpush.msra.mxu0 %v1498_v18  ;;  %v1808_v18 = vld [vmem:[#allocation10 + $0xc8] sm:$0xff] }
 0x76f   : > { %1597 = vmatpush.msrb.mxu1 %v1508_v8  ;;  %v1796_v8 = vld [vmem:[#allocation10 + $0x70] sm:$0xff] }
 0x771   : > { %1598 = vmatpush.msrb.mxu1 %v1505_v11  ;;  %v1794_v11 = vld [vmem:[#allocation10 + $0x60] sm:$0xff] }
 0x773   : > { %1599 = vmatpush.msrb.mxu1 %v1502_v16  ;;  %v1809_v16 = vld [vmem:[#allocation10 + $0xd0] sm:$0xff] }
 0x775   : > { %1600 = vmatpush.msrb.mxu1 %v1499_v19  ;;  %v1791_v19 = vld [vmem:[#allocation10 + $0x48] sm:$0xff] }
 0x777   : > { %1724 = vmatpush.msra.mxu1 %v1723_v30 }
 0x779   : > { %1725 = vmatpush.msra.mxu1 %v1722_v31  ;;  %v1786_v31 = vld [vmem:[#allocation10 + $0x20] sm:$0xff] }
 0x77b   : > { %1726 = vmatpush.msra.mxu1 %v1721_v33  ;;  %v1784_v33 = vld [vmem:[#allocation10 + $0x10] sm:$0xff] }
 0x77d   : > { %1727 = vmatpush.msra.mxu1 %v1720_v35  ;;  %v1783_v35 = vld [vmem:[#allocation10 + $0x8] sm:$0xff] }
 0x77f   : > { %1728 = vmatpush.msra.mxu1 %v1719_v36  ;;  %v1782_v36 = vld [vmem:[#allocation10] sm:$0xff] }
 0x7cc   : > { %v1460_v20 = vpop.f32.mrf.mxu0 }
 0x7cd   : > { %v1461_v22 = vadd.f32 %v1460_v20, %v1413_v21  ;;  %v1807_v20 = vld [vmem:[#allocation10 + $0xc0] sm:$0xff] }
 0x7ce   : > { %v1790_v21 = vld [vmem:[#allocation10 + $0x40] sm:$0xff] }
 0x7d3   : > { %v1485_v24 = vpop.f32.mrf.mxu1 }
 0x7d4   : > { %v1488_v14 = vadd.f32 %v1485_v24, %v1461_v22  ;;  %v1806_v22 = vld [vmem:[#allocation10 + $0xb8] sm:$0xff]  ;;  %v1805_v24 = vld [vmem:[#allocation10 + $0xb0] sm:$0xff] }
 0x7d6   : > { %v1494_v7 = vadd.f32 %v2235_v23, %v1488_v14  ;;  %v1789_v23 = vld [vmem:[#allocation10 + $0x38] sm:$0xff]  ;;  %v1788_v14 = vld [vmem:[#allocation10 + $0x30] sm:$0xff] }
 0x7d8   : > { %v1495_v25 = vmax.f32 %v1494_v7, 0.0  ;;  %v1804_v7 = vld [vmem:[#allocation10 + $0xa8] sm:$0xff] }
 0x7da   : > { %1561 = vmatmul.f32.vlgmr.msrb.gmra.mxu2 %v1495_v25  ;;  %1581 = vmatmul.f32.vlgmr.msra.gmra.mxu0 %v1495_v25 }
 0x7db   : > { %1601 = vmatmul.f32.vlgmr.msrb.gmra.mxu1 %v1495_v25  ;;  %v1787_v25 = vld [vmem:[#allocation10 + $0x28] sm:$0xff] }
 0x857   : > { %v1582_v50 = vpop.f32.mrf.mxu0 }
 0x858   : > { %v1602_v26 = vpop.f32.mrf.mxu1 }
 0x859   : > { %2115 = vmatpush.msk.msra.mxu2 %vm1439_vm8, %v1602_v26  ;;  %v1803_v26 = vld [vmem:[#allocation10 + $0xa0] sm:$0xff] }
 0x85a   : > { %2116 = vmatmul.msk.f32.vlgmr.msra.gmra.mxu2 %vm1436_vm9, %v2691_v12  ;;  %v1756_v12 = vld [vmem:[#allocation8 + $0x158] sm:$0xff] }
 0x85b   : > { %1761 = vmatpush.msrb.mxu2 %v1760_v28 }
 0x85d   : > { %v1562_v27 = vpop.f32.mrf.mxu2  ;;  %1762 = vmatpush.msrb.mxu2 %v1759_v29 }
 0x85e   : > { %2113 = vmatpush.msk.msrb.mxu3 %vm1439_vm8, %v1562_v27  ;;  %v1802_v27 = vld [vmem:[#allocation10 + $0x98] sm:$0xff] }
 0x85f   : > { %2114 = vmatmul.msk.f32.vlgmr.msrb.gmra.mxu3 %vm1436_vm9, %v2678_v2  ;;  %1763 = vmatpush.msrb.mxu2 %v1758_v32  ;;  %v1718_v2 = vld [vmem:[#allocation7 + $0x150] sm:$0xff]  ;;  %v1785_v32 = vld [vmem:[#allocation10 + $0x18] sm:$0xff] }
 0x860   : > { %1729 = vmatpush.msra.mxu1 %v1718_v2  ;;  %v1877_v2 = vld [vmem:[#allocation10 + $0x178] sm:$0xff] }
 0x861   : > { %1764 = vmatpush.msrb.mxu2 %v1757_v34  ;;  %v1801_v34 = vld [vmem:[#allocation10 + $0x90] sm:$0xff] }
 0x862   : > { %1730 = vmatpush.msra.mxu1 %v1717_v39  ;;  %v1875_v39 = vld [vmem:[#allocation10 + $0x168] sm:$0xff] }
 0x863   : > { %1765 = vmatpush.msrb.mxu2 %v1756_v12  ;;  %v1800_v12 = vld [vmem:[#allocation10 + $0x88] sm:$0xff] }
 0x864   : > { %1731 = vmatpush.msra.mxu1 %v1716_v41  ;;  %v1873_v41 = vld [vmem:[#allocation10 + $0x158] sm:$0xff] }
 0x865   : > { %1766 = vmatpush.msrb.mxu2 %v1755_v37  ;;  %v1799_v37 = vld [vmem:[#allocation10 + $0x80] sm:$0xff] }
 0x866   : > { %1732 = vmatpush.msra.mxu1 %v1715_v43  ;;  %v1871_v43 = vld [vmem:[#allocation10 + $0x148] sm:$0xff] }
 0x867   : > { %1767 = vmatpush.msrb.mxu2 %v1754_v38  ;;  %v1876_v38 = vld [vmem:[#allocation10 + $0x170] sm:$0xff] }
 0x868   : > { %1733 = vmatpush.msra.mxu1 %v1714_v45  ;;  %v1869_v45 = vld [vmem:[#allocation10 + $0x138] sm:$0xff] }
 0x869   : > { %1768 = vmatpush.msrb.mxu2 %v1753_v40  ;;  %v1874_v40 = vld [vmem:[#allocation10 + $0x160] sm:$0xff] }
 0x86a   : > { %1734 = vmatpush.msra.mxu1 %v1713_v47  ;;  %v1867_v47 = vld [vmem:[#allocation10 + $0x128] sm:$0xff] }
 0x86b   : > { %1769 = vmatpush.msrb.mxu2 %v1752_v42  ;;  %v1872_v42 = vld [vmem:[#allocation10 + $0x150] sm:$0xff] }
 0x86c   : > { %1735 = vmatpush.msra.mxu1 %v1712_v60  ;;  %v1915_v60 = vld [vmem:[#allocation10 + $0x1e8] sm:$0xff] }
 0x86d   : > { %1770 = vmatpush.msrb.mxu2 %v1751_v44  ;;  %v1870_v44 = vld [vmem:[#allocation10 + $0x140] sm:$0xff] }
 0x86e   : > { %1736 = vmatpush.msra.mxu1 %v1711_v61  ;;  %v1914_v61 = vld [vmem:[#allocation10 + $0x1e0] sm:$0xff] }
 0x86f   : > { %1771 = vmatpush.msrb.mxu2 %v1750_v46  ;;  %v1868_v46 = vld [vmem:[#allocation10 + $0x130] sm:$0xff] }
 0x870   : > { %1737 = vmatpush.msra.mxu1 %v1710_v62  ;;  %v1913_v62 = vld [vmem:[#allocation10 + $0x1d8] sm:$0xff] }
 0x871   : > { %1772 = vmatpush.msrb.mxu2 %v1749_v49  ;;  %v1866_v49 = vld [vmem:[#allocation10 + $0x120] sm:$0xff] }
 0x872   : > { %1738 = vmatpush.msra.mxu1 %v1709_v0  ;;  %v1911_v0 = vld [vmem:[#allocation10 + $0x1c8] sm:$0xff] }
 0x873   : > { %1773 = vmatpush.msrb.mxu2 %v1748_v55 }
 0x874   : > { %1739 = vmatpush.msra.mxu1 %v1708_v4  ;;  %v1909_v4 = vld [vmem:[#allocation10 + $0x1b8] sm:$0xff] }
 0x875   : > { %1774 = vmatpush.msrb.mxu2 %v1747_v58  ;;  %v1863_v58 = vld [vmem:[#allocation10 + $0x108] sm:$0xff] }
 0x876   : > { %1880 = vmatpush.msrb.mxu1 %v1877_v2 }
 0x877   : > { %1775 = vmatpush.msrb.mxu2 %v1746_v63  ;;  %v1912_v63 = vld [vmem:[#allocation10 + $0x1d0] sm:$0xff] }
 0x878   : > { %1881 = vmatpush.msrb.mxu1 %v1876_v38 }
 0x879   : > { %1776 = vmatpush.msrb.mxu2 %v1745_v3  ;;  %v1910_v3 = vld [vmem:[#allocation10 + $0x1c0] sm:$0xff] }
 0x87a   : > { %1882 = vmatpush.msrb.mxu1 %v1875_v39 }
 0x87c   : > { %1883 = vmatpush.msrb.mxu1 %v1874_v40 }
 0x87e   : > { %1884 = vmatpush.msrb.mxu1 %v1873_v41 }
 0x880   : > { %1885 = vmatpush.msrb.mxu1 %v1872_v42 }
 0x882   : > { %1886 = vmatpush.msrb.mxu1 %v1871_v43 }
 0x884   : > { %1887 = vmatpush.msrb.mxu1 %v1870_v44 }
 0x886   : > { %1888 = vmatpush.msrb.mxu1 %v1869_v45 }
 0x888   : > { %1889 = vmatpush.msrb.mxu1 %v1868_v46 }
 0x88a   : > { %1890 = vmatpush.msrb.mxu1 %v1867_v47 }
 0x88c   : > { %1891 = vmatpush.msrb.mxu1 %v1866_v49 }
 0x8dd   : > { %v1648_v54 = vpop.f32.mrf.mxu2 }
 0x8e2   : > { %v1625_v52 = vpop.f32.mrf.mxu3 }
 0x8e3   : > { %v1626_v56 = vadd.f32 %v1625_v52, %v1582_v50 }
 0x8e5   : > { %v1651_v53 = vadd.f32 %v1648_v54, %v1626_v56  ;;  %v1865_v56 = vld [vmem:[#allocation10 + $0x118] sm:$0xff] }
 0x8e6   : > { %1892 = vmatpush.msrb.mxu1 %v1865_v56 }
 0x8e7   : > { %v1657_v1 = vadd.f32 %v2236_v57, %v1651_v53  ;;  %v1864_v57 = vld [vmem:[#allocation10 + $0x110] sm:$0xff]  ;;  %v1862_v53 = vld [vmem:[#allocation10 + $0x100] sm:$0xff] }
 0x8e8   : > { %1893 = vmatpush.msrb.mxu1 %v1864_v57 }
 0x8e9   : > { %v1658_v59 = vmax.f32 %v1657_v1, 0.0  ;;  %v1917_v1 = vld [vmem:[#allocation10 + $0x1f8] sm:$0xff] }
 0x8ea   : > { %1894 = vmatpush.msrb.mxu1 %v1863_v58  ;;  %1920 = vmatpush.msra.mxu2 %v1917_v1 }
 0x8eb   : > { %2117 = vmatpush.msk.msra.mxu3 %vm1439_vm8, %v1658_v59  ;;  %2119 = vmatpush.msk.msrb.mxu0 %vm1439_vm8, %v1658_v59  ;;  %v1916_v59 = vld [vmem:[#allocation10 + $0x1f0] sm:$0xff] }
 0x8ec   : > { %2118 = vmatmul.msk.f32.vlgmr.msra.gmra.mxu3 %vm1436_vm9, %v2712_v51  ;;  %2120 = vmatmul.msk.f32.vlgmr.msrb.gmra.mxu0 %vm1436_vm9, %v2718_v48  ;;  %v1797_v51 = vld [vmem:[#allocation10 + $0x78] sm:$0xff]  ;;  %v1812_v48 = vld [vmem:[#allocation10 + $0xe8] sm:$0xff] }
 0x8ed   : > { %1818 = vmatpush.msrb.mxu3 %v1814_v5  ;;  %1838 = vmatpush.msra.mxu0 %v1797_v51  ;;  %v1908_v5 = vld [vmem:[#allocation10 + $0x1b0] sm:$0xff]  ;;  %v1906_v51 = vld [vmem:[#allocation10 + $0x1a0] sm:$0xff] }
 0x8ee   : > { %1895 = vmatpush.msrb.mxu1 %v1862_v53  ;;  %1921 = vmatpush.msra.mxu2 %v1916_v59 }
 0x8ef   : > { %1819 = vmatpush.msrb.mxu3 %v1813_v6  ;;  %1839 = vmatpush.msra.mxu0 %v1796_v8  ;;  %v1907_v6 = vld [vmem:[#allocation10 + $0x1a8] sm:$0xff]  ;;  %v1905_v8 = vld [vmem:[#allocation10 + $0x198] sm:$0xff] }
 0x8f0   : > { %1922 = vmatpush.msra.mxu2 %v1915_v60 }
 0x8f1   : > { %1820 = vmatpush.msrb.mxu3 %v1812_v48  ;;  %1840 = vmatpush.msra.mxu0 %v1795_v9 }
 0x8f2   : > { %1923 = vmatpush.msra.mxu2 %v1914_v61 }
 0x8f3   : > { %1821 = vmatpush.msrb.mxu3 %v1811_v10  ;;  %1841 = vmatpush.msra.mxu0 %v1794_v11  ;;  %v1858_v10 = vld [vmem:[#allocation11] sm:$0x1] }
 0x8f4   : > { %1924 = vmatpush.msra.mxu2 %v1913_v62 }
 0x8f5   : > { %1822 = vmatpush.msrb.mxu3 %v1810_v13  ;;  %1842 = vmatpush.msra.mxu0 %v1793_v15 }
 0x8f6   : > { %1925 = vmatpush.msra.mxu2 %v1912_v63 }
 0x8f7   : > { %1823 = vmatpush.msrb.mxu3 %v1809_v16  ;;  %1843 = vmatpush.msra.mxu0 %v1792_v17  ;;  %v1904_v16 = vld [vmem:[#allocation10 + $0x190] sm:$0xff]  ;;  %v1903_v17 = vld [vmem:[#allocation10 + $0x188] sm:$0xff] }
 0x8f8   : > { %1926 = vmatpush.msra.mxu2 %v1911_v0 }
 0x8f9   : > { %1824 = vmatpush.msrb.mxu3 %v1808_v18  ;;  %1844 = vmatpush.msra.mxu0 %v1791_v19  ;;  %v1902_v18 = vld [vmem:[#allocation10 + $0x180] sm:$0xff] }
 0x8fa   : > { %1927 = vmatpush.msra.mxu2 %v1910_v3  ;;  %v1879_v19 = vld [vmem:[#allocation11 + $0x1] sm:$0x1] }
 0x8fb   : > { %1825 = vmatpush.msrb.mxu3 %v1807_v20  ;;  %1845 = vmatpush.msra.mxu0 %v1790_v21 }
 0x8fc   : > { %1928 = vmatpush.msra.mxu2 %v1909_v4 }
 0x8fd   : > { %1826 = vmatpush.msrb.mxu3 %v1806_v22  ;;  %1846 = vmatpush.msra.mxu0 %v1789_v23  ;;  %v1919_v23 = vld [vmem:[#allocation11 + $0x2] sm:$0x1] }
 0x8fe   : > { %1929 = vmatpush.msra.mxu2 %v1908_v5 }
 0x8ff   : > { %1827 = vmatpush.msrb.mxu3 %v1805_v24  ;;  %1847 = vmatpush.msra.mxu0 %v1788_v14 }
 0x900   : > { %1930 = vmatpush.msra.mxu2 %v1907_v6 }
 0x901   : > { %1828 = vmatpush.msrb.mxu3 %v1804_v7  ;;  %1848 = vmatpush.msra.mxu0 %v1787_v25 }
 0x902   : > { %1931 = vmatpush.msra.mxu2 %v1906_v51 }
 0x903   : > { %1829 = vmatpush.msrb.mxu3 %v1803_v26  ;;  %1849 = vmatpush.msra.mxu0 %v1786_v31 }
 0x904   : > { %1932 = vmatpush.msra.mxu2 %v1905_v8 }
 0x905   : > { %1830 = vmatpush.msrb.mxu3 %v1802_v27  ;;  %1850 = vmatpush.msra.mxu0 %v1785_v32 }
 0x906   : > { %1933 = vmatpush.msra.mxu2 %v1904_v16 }
 0x907   : > { %1851 = vmatpush.msra.mxu0 %v1784_v33  ;;  %1831 = vmatpush.msrb.mxu3 %v1801_v34 }
 0x908   : > { %1934 = vmatpush.msra.mxu2 %v1903_v17 }
 0x909   : > { %1852 = vmatpush.msra.mxu0 %v1783_v35  ;;  %1832 = vmatpush.msrb.mxu3 %v1800_v12 }
 0x90a   : > { %1935 = vmatpush.msra.mxu2 %v1902_v18 }
 0x90b   : > { %1853 = vmatpush.msra.mxu0 %v1782_v36  ;;  %1833 = vmatpush.msrb.mxu3 %v1799_v37 }
 0x969   : > { %v1703_v28 = vpop.f32.mrf.mxu0 }
 0x96f   : > { %v1681_v29 = vpop.f32.mrf.mxu3 }
 0x970   : > { %v1706_v30 = vmax.f32 %v1681_v29, %v1703_v28 }
 0x972   : > { %1777 = vmatmul.f32.vlgmr.msrb.gmra.mxu2 %v1706_v30  ;;  %1740 = vmatmul.f32.vlgmr.msra.gmra.mxu1 %v1706_v30 }
 0x9ef   : > { %v1741_v50 = vpop.f32.mrf.mxu1 }
 0x9f5   : > { %v1778_v52 = vpop.f32.mrf.mxu2 }
 0x9f6   : > { %v1781_v54 = vmax.f32 %v1741_v50, %v1778_v52 }
 0x9f8   : > { %v1816_v55 = vrot.slane %v1781_v54, 1  ;;  %1854 = vmatmul.f32.vlgmr.msra.gmra.mxu0 %v1781_v54 }
 0x9fa   : > { %1834 = vmatmul.f32.vlgmr.msrb.gmra.mxu3 %v1816_v55 }
 0xa75   : > { %v1855_v48 = vpop.f32.mrf.mxu0 }
 0xa7d   : > { %v1835_v9 = vpop.f32.mrf.mxu3 }
 0xa7e   : > { %v1856_v11 = vadd.f32 %v1855_v48, %v1835_v9 }
 0xa80   : > { %v1859_v13 = vadd.f32 %v1858_v10, %v1856_v11 }
 0xa82   : > { %v1860_v15 = vmax.f32 %v1859_v13, 0.0 }
 0xa84   : > { %1896 = vmatmul.f32.vlgmr.msrb.gmra.mxu1 %v1860_v15 }
 0xb01   : > { %v1897_v20 = vpop.f32.mrf.mxu1 }
 0xb02   : > { %v1898_v21 = vadd.f32 %v1897_v20, %v1879_v19 }
 0xb04   : > { %v1900_v22 = vmax.f32 %v1898_v21, 0.0 }
 0xb06   : > { %1936 = vmatmul.f32.vlgmr.msra.gmra.mxu2 %v1900_v22 }
 0xb89   : > { %v1937_v24 = vpop.f32.mrf.mxu2 }
 0xb8a   : > { %v1938_v14 = vadd.f32 %v1937_v24, %v1919_v23 }
 0xb8c   : > { %1940 = vst [vmem:[%s370_s15] sm:$0x1] %v1938_v14 }
 0xb8d   : > { %2444 = shalt.err (!%p2441_p8)
}
 0xb8e   : > { %2148 = dma.vmem_to_hbm [thread:$0]  (%p2588_p5), %s1953_s22, 16, %s1955_s2, %s1942_s10  }
 0xb8f PF: > { %p2185_p9 = scmp.ge.s32.totalorder %s2495_s27, 2  ;;  %s1966_s3 = sand.u32 1, %s2483_s24  }
 0xb90   : > { %s1967_s13 = scalar_lea.sflag [#allocation4], %s1966_s3 }
 0xb91   : > { %p2170_p10 = pnand %p2185_p9, %p2592_p6 }
 0xb93   : > { %p2171_p11 = pneg %p2170_p10 }
 0xb95   : > { %2478 = dma.done.wait (%p2171_p11), %s1967_s13, 16  }
 0xb96   : > { %2480 = vsyncadd (%p2171_p11), %s1967_s13, 4294967280  ;;  %s2809_s19 = sld [smem:[#allocation19_spill]]  ;;  %p21_p12 = scmp.ge.s32.totalorder %s2575_s30, 4  }
 0xb97   : > { %s2810_s24 = smov %s2487_s25  ;;  %s2811_s25 = smov %s2491_s26 }
 0xb98   : > { %s2813_s27 = smov %s2575_s30  ;;  %23 = sbr.rel (!%p21_p12) target bundleno = 12 (0xc), region = 127 }
 0xb9c   : > { %s2812_s26 = smov %s2809_s19 }
 0xb9d   :  { %1972 = vsyncpa [#allocation3], 1 }
 0xb9e   :  { %1974 = vsyncpa [#allocation3 + $0x1], 1 }
 0xb9f   :  { %1975 = vsyncpa [#allocation6], 1 }
 0xba0   :  { %1976 = vsyncpa [#allocation9], 1 }
 0xba1   :  { %1977 = vsyncpa [#allocation12], 1 }
 0xba2   :  { %1978 = vsyncpa [#allocation4], 1 }
 0xba3   :  { %1980 = vsyncpa [#allocation4 + $0x1], 1 }

</bundles_post_ra>
